<compile_context>
chip_gen: v5e
topology: v5e:2x2
jax: 0.10.0
libtpu: 0.0.40
codegen_flags: <defaults>
</compile_context>

<pallas_src>
import functools

import jax
import jax.numpy as jnp
from jax.experimental import pallas as pl
from jax.experimental.pallas import tpu as pltpu


# ----------------------------------------------------------------------------
# helpers
# ----------------------------------------------------------------------------

def _round_up(x, m):
    return ((x + m - 1) // m) * m


def _pick_tile(n, max_tile=512):
    """Largest lane tile (multiple of 128) <= max_tile that divides n, else the full extent."""
    if n <= max_tile:
        return n
    for t in (max_tile, 384, 256, 128):
        if n % t == 0:
            return t
    return n  # fall back to a full-extent block (always a legal BlockSpec)


# ----------------------------------------------------------------------------
# Pallas kernels
# ----------------------------------------------------------------------------

def _tnet_local_kernel(*refs, num_layers):
    """Fused shared-MLP chain + running global max over the points axis.

    refs = [x, (w, b) * num_layers, out]
      x   : (Cin, TN) f32 tile          (channels on sublanes, points on lanes)
      w_i : (Co, Ci) bf16, b_i: (Co, 1) f32
      out : (C_last, 1) f32  -- resident accumulator across the N-tile (arbitrary) axis.
    """
    x_ref = refs[0]
    wb = refs[1:1 + 2 * num_layers]
    o_ref = refs[-1]

    h = x_ref[...].astype(jnp.bfloat16)
    h32 = None
    for i in range(num_layers):
        w = wb[2 * i][...]
        b = wb[2 * i + 1][...]
        h32 = jnp.maximum(
            jnp.dot(w, h, preferred_element_type=jnp.float32) + b, 0.0)
        h = h32.astype(jnp.bfloat16)

    tile_max = jnp.max(h32, axis=-1, keepdims=True)        # (C_last, 1)
    t = pl.program_id(1)

    @pl.when(t == 0)
    def _():
        o_ref[...] = tile_max

    @pl.when(t > 0)
    def _():
        o_ref[...] = jnp.maximum(o_ref[...], tile_max)


def _tnet_head_kernel(g_ref, w1_ref, b1_ref, w2_ref, b2_ref, w3_ref, b3_ref,
                      o_ref, h_ref):
    """Fused global head: relu(g@W1t+b1) -> relu(.@W2t+b2) -> .@W3t+b3, tiled over K (last dim).

    The (B, 256) hidden state is computed once (k==0) and kept in a VMEM scratch.
    """
    @pl.when(pl.program_id(0) == 0)
    def _():
        g = g_ref[...].astype(jnp.bfloat16)
        h1 = jnp.maximum(
            jnp.dot(g, w1_ref[...], preferred_element_type=jnp.float32) + b1_ref[...], 0.0)
        h2 = jnp.maximum(
            jnp.dot(h1.astype(jnp.bfloat16), w2_ref[...],
                    preferred_element_type=jnp.float32) + b2_ref[...], 0.0)
        h_ref[...] = h2

    o_ref[...] = (jnp.dot(h_ref[...].astype(jnp.bfloat16), w3_ref[...],
                          preferred_element_type=jnp.float32) + b3_ref[...])


def _fused_mlp_features_kernel(*refs, num_layers):
    """Fused stem SharedMLP: every layer's output tile is stored (needed for end_points) but
    intermediates are never re-read from HBM.  First weight is per-batch (input bmm folded in).

    refs = [x, (w, b) * num_layers, out_0 ... out_{num_layers-1}]
    """
    x_ref = refs[0]
    wb = refs[1:1 + 2 * num_layers]
    outs = refs[1 + 2 * num_layers:]

    h = x_ref[...].astype(jnp.bfloat16)
    for i in range(num_layers):
        w = wb[2 * i][...]
        b = wb[2 * i + 1][...]
        h32 = jnp.maximum(
            jnp.dot(w, h, preferred_element_type=jnp.float32) + b, 0.0)
        outs[i][...] = h32
        h = h32.astype(jnp.bfloat16)


def _bmm_kernel(a_ref, x_ref, o_ref):
    # a: (M, K) f32, x: (K, TN) f32 -> o: (M, TN) f32, bf16 MXU operands / f32 accumulate.
    o_ref[...] = jnp.dot(a_ref[...].astype(jnp.bfloat16),
                         x_ref[...].astype(jnp.bfloat16),
                         preferred_element_type=jnp.float32)


# ----------------------------------------------------------------------------
# pallas_call wrappers
# ----------------------------------------------------------------------------

def tnet_local_maxpool(x, local, tn):
    """x: (B, Cin, N) f32; local: list of (w bf16 (Co,Ci), b f32 (Co,1)).  Returns (B, C_last, 1)."""
    B, Ci, N = x.shape
    nt = N // tn
    c_last = local[-1][0].shape[0]

    in_specs = [pl.BlockSpec((None, Ci, tn), lambda b, t: (b, 0, t))]
    args = [x]
    for (w, bvec) in local:
        co, ci = w.shape
        in_specs.append(pl.BlockSpec((co, ci), lambda b, t: (0, 0)))
        in_specs.append(pl.BlockSpec((co, 1), lambda b, t: (0, 0)))
        args += [w, bvec]

    kern = functools.partial(_tnet_local_kernel, num_layers=len(local))
    return pl.pallas_call(
        kern,
        out_shape=jax.ShapeDtypeStruct((B, c_last, 1), jnp.float32),
        grid=(B, nt),
        in_specs=in_specs,
        out_specs=pl.BlockSpec((None, c_last, 1), lambda b, t: (b, 0, 0)),
        compiler_params=pltpu.CompilerParams(
            dimension_semantics=("parallel", "arbitrary")),
    )(*args)


def tnet_head(g, head):
    """g: (B, 1024) f32 -> (B, K) f32 in one call (K tiled to bound VMEM for the 256xK weight)."""
    B, C = g.shape
    K = head["w3t"].shape[1]
    tk = 2048 if (K > 2048 and K % 2048 == 0) else K
    nk = K // tk
    h_dim = head["w2t"].shape[1]

    return pl.pallas_call(
        _tnet_head_kernel,
        out_shape=jax.ShapeDtypeStruct((B, K), jnp.float32),
        grid=(nk,),
        in_specs=[
            pl.BlockSpec((B, C), lambda k: (0, 0)),
            pl.BlockSpec(head["w1t"].shape, lambda k: (0, 0)),
            pl.BlockSpec(head["b1"].shape, lambda k: (0, 0)),
            pl.BlockSpec(head["w2t"].shape, lambda k: (0, 0)),
            pl.BlockSpec(head["b2"].shape, lambda k: (0, 0)),
            pl.BlockSpec((head["w3t"].shape[0], tk), lambda k: (0, k)),
            pl.BlockSpec((1, tk), lambda k: (0, k)),
        ],
        out_specs=pl.BlockSpec((B, tk), lambda k: (0, k)),
        scratch_shapes=[pltpu.VMEM((B, h_dim), jnp.float32)],
        compiler_params=pltpu.CompilerParams(dimension_semantics=("arbitrary",)),
    )(g, head["w1t"], head["b1"], head["w2t"], head["b2"], head["w3t"], head["b3"])


def stem_mlp_fused(x, w0_batched, b0, rest, tn):
    """Fused stem SharedMLP with the input transform folded into the per-batch first weight.

    x: (B, Ci, N) f32, w0_batched: (B, C0, Ci) bf16, b0: (C0, 1) f32,
    rest: list of (w bf16 (Co, Ci), b f32 (Co, 1)).  Returns a tuple of per-layer features.
    """
    B, Ci, N = x.shape
    nt = N // tn
    c0 = w0_batched.shape[1]
    chans = [c0] + [w.shape[0] for (w, _) in rest]

    in_specs = [
        pl.BlockSpec((None, Ci, tn), lambda b, t: (b, 0, t)),
        pl.BlockSpec((None, c0, Ci), lambda b, t: (b, 0, 0)),
        pl.BlockSpec((c0, 1), lambda b, t: (0, 0)),
    ]
    args = [x, w0_batched, b0]
    for (w, bvec) in rest:
        co, ci = w.shape
        in_specs.append(pl.BlockSpec((co, ci), lambda b, t: (0, 0)))
        in_specs.append(pl.BlockSpec((co, 1), lambda b, t: (0, 0)))
        args += [w, bvec]

    out_shapes = tuple(jax.ShapeDtypeStruct((B, c, N), jnp.float32) for c in chans)
    out_specs = tuple(pl.BlockSpec((None, c, tn), lambda b, t: (b, 0, t)) for c in chans)

    kern = functools.partial(_fused_mlp_features_kernel, num_layers=len(chans))
    return pl.pallas_call(
        kern,
        out_shape=out_shapes,
        grid=(B, nt),
        in_specs=in_specs,
        out_specs=out_specs,
        compiler_params=pltpu.CompilerParams(
            dimension_semantics=("parallel", "parallel")),
    )(*args)


def bmm_tiled(a, x, tn):
    """torch.bmm(a, x): a: (B, M, K), x: (B, K, N) -> (B, M, N), tiled over the points axis."""
    B, M, K = a.shape
    N = x.shape[-1]
    nt = N // tn
    return pl.pallas_call(
        _bmm_kernel,
        out_shape=jax.ShapeDtypeStruct((B, M, N), jnp.float32),
        grid=(B, nt),
        in_specs=[
            pl.BlockSpec((None, M, K), lambda b, t: (b, 0, 0)),
            pl.BlockSpec((None, K, tn), lambda b, t: (b, 0, t)),
        ],
        out_specs=pl.BlockSpec((None, M, tn), lambda b, t: (b, 0, t)),
        compiler_params=pltpu.CompilerParams(
            dimension_semantics=("parallel", "parallel")),
    )(a, x)


# ----------------------------------------------------------------------------
# Deterministic parameters (eval-mode BN folded, kernel-ready layout: bf16 weights,
# pre-transposed dense weights, pre-reshaped biases, channel padding)
# ----------------------------------------------------------------------------

def conv_bn_params(key, cin, cout):
    k1, k2, k3, k4 = jax.random.split(key, 4)
    w = jax.random.normal(k1, (cout, cin), jnp.float32) / jnp.sqrt(jnp.float32(cin))
    b = 0.01 * jax.random.normal(k2, (cout,), jnp.float32)
    gamma = 1.0 + 0.01 * jax.random.normal(k3, (cout,), jnp.float32)
    beta = 0.01 * jax.random.normal(k4, (cout,), jnp.float32)
    running_mean = jnp.zeros((cout,), jnp.float32)
    running_var = jnp.ones((cout,), jnp.float32)
    eps = 1e-5
    scale = gamma / jnp.sqrt(running_var + eps)
    w_eff = w * scale[:, None]
    b_eff = (b - running_mean) * scale + beta
    return w_eff, b_eff
    # TODO(synk): training-mode BatchNorm (batch statistics) is not implemented; eval-mode fold only.


def _prep_conv(wb, cin_pad=None):
    w, b = wb
    if cin_pad is not None and cin_pad != w.shape[1]:
        w = jnp.pad(w, ((0, 0), (0, cin_pad - w.shape[1])))
    return w.astype(jnp.bfloat16), b.reshape(-1, 1)


def tnet_params(key, in_channels, out_channels, cin_pad):
    keys = jax.random.split(key, 6)
    local_raw = [
        conv_bn_params(keys[0], in_channels, 64),
        conv_bn_params(keys[1], 64, 128),
        conv_bn_params(keys[2], 128, 1024),
    ]
    local = [_prep_conv(local_raw[0], cin_pad),
             _prep_conv(local_raw[1]),
             _prep_conv(local_raw[2])]
    g1 = conv_bn_params(keys[3], 1024, 512)
    g2 = conv_bn_params(keys[4], 512, 256)
    lin_w = 1e-3 * jax.random.normal(keys[5], (out_channels * in_channels, 256), jnp.float32)
    lin_b = jnp.zeros((out_channels * in_channels,), jnp.float32)
    head = dict(
        w1t=g1[0].T.astype(jnp.bfloat16), b1=g1[1].reshape(1, -1),
        w2t=g2[0].T.astype(jnp.bfloat16), b2=g2[1].reshape(1, -1),
        w3t=lin_w.T.astype(jnp.bfloat16), b3=lin_b.reshape(1, -1),
    )
    return dict(local=local, head=head, cin=in_channels, cout=out_channels)


def stem_params(key, in_channels, stem_channels=(64, 128, 128)):
    cin_pad = _round_up(in_channels, 8)
    keys = jax.random.split(key, len(stem_channels) + 2)
    mlp_raw = []
    c = in_channels
    for i, co in enumerate(stem_channels):
        mlp_raw.append(conv_bn_params(keys[i], c, co))
        c = co
    mlp = dict(
        w0_f32=mlp_raw[0][0],                 # kept f32 for the per-batch (W0 @ T) fold
        b0=mlp_raw[0][1].reshape(-1, 1),
        rest=[_prep_conv(wb) for wb in mlp_raw[1:]],
    )
    feat_c = stem_channels[-1]
    return dict(
        mlp=mlp,
        tnet_in=tnet_params(keys[-2], in_channels, in_channels, cin_pad),
        tnet_feat=tnet_params(keys[-1], feat_c, feat_c, _round_up(feat_c, 8)),
        in_channels=in_channels,
        cin_pad=cin_pad,
        stem_channels=tuple(stem_channels),
    )


# ----------------------------------------------------------------------------
# Forward passes (thin glue; all hot-path math inside the fused Pallas kernels)
# ----------------------------------------------------------------------------

def tnet_forward(x, p, tn):
    """TNet: fused SharedMLP(64,128,1024)+max-pool -> fused MLP(512,256)+Linear -> +I."""
    B = x.shape[0]
    g = tnet_local_maxpool(x, p["local"], tn)            # (B, 1024, 1)
    g = g[:, :, 0]                                       # (B, 1024)
    t = tnet_head(g, p["head"])                          # (B, cout*cin)
    t = t.reshape(B, p["cout"], p["cin"]) + jnp.eye(p["cout"], p["cin"], dtype=jnp.float32)
    return t


def stem_forward(x, params):
    """Mirrors Stem.forward (with_transform=True): (B, C_in, N) -> ((B, 128, N), end_points)."""
    B, cin, N = x.shape
    cin_pad = params["cin_pad"]
    tn = _pick_tile(N)
    end_points = {}

    x_pad = x if cin_pad == cin else jnp.pad(x, ((0, 0), (0, cin_pad - cin), (0, 0)))

    # ---- input transform ----
    trans_input = tnet_forward(x_pad, params["tnet_in"], tn)     # (B, cin, cin)
    end_points["trans_input"] = trans_input

    # ---- fold bmm(trans_input, x) into the first stem conv: W0 @ (T @ x) == (W0 @ T) @ x ----
    w0 = params["mlp"]["w0_f32"]                                  # (C0, cin) f32
    w0_eff = jnp.einsum("oc,bci->boi", w0, trans_input)           # (B, C0, cin)
    if cin_pad != cin:
        w0_eff = jnp.pad(w0_eff, ((0, 0), (0, 0), (0, cin_pad - cin)))
    w0_eff = w0_eff.astype(jnp.bfloat16)

    feats = stem_mlp_fused(x_pad, w0_eff, params["mlp"]["b0"], params["mlp"]["rest"], tn)
    end_points["stem_features"] = list(feats)
    x_out = feats[-1]                                             # (B, C_last, N) f32

    # ---- feature transform (depends on the full last feature map, so cannot fuse the bmm) ----
    feat_c = params["stem_channels"][-1]
    feat_pad = _round_up(feat_c, 8)
    xf = x_out if feat_pad == feat_c else jnp.pad(x_out, ((0, 0), (0, feat_pad - feat_c), (0, 0)))
    trans_feature = tnet_forward(xf, params["tnet_feat"], tn)     # (B, feat_c, feat_c)
    end_points["trans_feature"] = trans_feature

    x_final = bmm_tiled(trans_feature, x_out, tn)                 # (B, feat_c, N)
    return x_final, end_points


# ----------------------------------------------------------------------------
# Demo
# ----------------------------------------------------------------------------

if __name__ == "__main__":
    B, IN_CHANNELS, NUM_POINTS = 2, 3, 128
    STEM_CHANNELS = (64, 128, 128)

    key = jax.random.PRNGKey(0)
    kx, kp = jax.random.split(key)
    x = jax.random.normal(kx, (B, IN_CHANNELS, NUM_POINTS), jnp.float32)
    params = stem_params(kp, IN_CHANNELS, STEM_CHANNELS)

    out, end_points = stem_forward(x, params)
    out = jax.block_until_ready(out)
    jax.block_until_ready(end_points["trans_input"])
    jax.block_until_ready(end_points["trans_feature"])
    for f in end_points["stem_features"]:
        jax.block_until_ready(f)

    assert out.shape == (B, STEM_CHANNELS[-1], NUM_POINTS)
    assert end_points["trans_input"].shape == (B, IN_CHANNELS, IN_CHANNELS)
    assert end_points["trans_feature"].shape == (B, STEM_CHANNELS[-1], STEM_CHANNELS[-1])
    assert len(end_points["stem_features"]) == len(STEM_CHANNELS)
    assert bool(jnp.all(jnp.isfinite(out)))

    print("KERNEL_OK")
</pallas_src>

<mosaic_0001>
module attributes {stable_mosaic.version = 11 : i64} {
  func.func @_tnet_local_kernel(%arg0: i32, %arg1: i32, %arg2: memref<1x8x128xf32, #tpu.memory_space<vmem>>, %arg3: memref<64x8xbf16, #tpu.memory_space<vmem>>, %arg4: memref<64x1xf32, #tpu.memory_space<vmem>>, %arg5: memref<128x64xbf16, #tpu.memory_space<vmem>>, %arg6: memref<128x1xf32, #tpu.memory_space<vmem>>, %arg7: memref<1024x128xbf16, #tpu.memory_space<vmem>>, %arg8: memref<1024x1xf32, #tpu.memory_space<vmem>>, %arg9: memref<1x1024x1xf32, #tpu.memory_space<vmem>>) attributes {dimension_semantics = [#tpu.dimension_semantics<parallel>, #tpu.dimension_semantics<arbitrary>], iteration_bounds = array<i64: 2, 1>, scalar_prefetch = 0 : i64, scratch_operands = 0 : i64, tpu.core_type = #tpu.core_type<tc>, window_params = [{transform_indices = @transform_0, window_bounds = array<i64: 1, 8, 128>}, {pipeline_mode = #tpu.pipeline_mode<synchronous>, transform_indices = @transform_1, window_bounds = array<i64: 64, 8>}, {pipeline_mode = #tpu.pipeline_mode<synchronous>, transform_indices = @transform_2, window_bounds = array<i64: 64, 1>}, {pipeline_mode = #tpu.pipeline_mode<synchronous>, transform_indices = @transform_3, window_bounds = array<i64: 128, 64>}, {pipeline_mode = #tpu.pipeline_mode<synchronous>, transform_indices = @transform_4, window_bounds = array<i64: 128, 1>}, {pipeline_mode = #tpu.pipeline_mode<synchronous>, transform_indices = @transform_5, window_bounds = array<i64: 1024, 128>}, {pipeline_mode = #tpu.pipeline_mode<synchronous>, transform_indices = @transform_6, window_bounds = array<i64: 1024, 1>}, {transform_indices = @transform_7, window_bounds = array<i64: 1, 1024, 1>}]} {
    %c0 = arith.constant 0 : index
    %c0_0 = arith.constant 0 : index
    %c0_1 = arith.constant 0 : index
    %0 = vector.load %arg2[%c0, %c0_0, %c0_1] : memref<1x8x128xf32, #tpu.memory_space<vmem>>, vector<1x8x128xf32>
    %1 = vector.shape_cast %0 : vector<1x8x128xf32> to vector<8x128xf32>
    %2 = arith.truncf %1 : vector<8x128xf32> to vector<8x128xbf16>
    %c0_2 = arith.constant 0 : index
    %c0_3 = arith.constant 0 : index
    %3 = vector.load %arg3[%c0_2, %c0_3] : memref<64x8xbf16, #tpu.memory_space<vmem>>, vector<64x8xbf16>
    %c0_4 = arith.constant 0 : index
    %c0_5 = arith.constant 0 : index
    %4 = vector.load %arg4[%c0_4, %c0_5] : memref<64x1xf32, #tpu.memory_space<vmem>>, vector<64x1xf32>
    %cst = arith.constant dense<0.000000e+00> : vector<64x128xf32>
    %5 = tpu.matmul %3, %2, %cst {dimension_numbers = #tpu.dot_dimension_numbers<[1], [0], [0], [1], [0, 0, 1, 1], [], []>} : vector<64x8xbf16>, vector<8x128xbf16>, vector<64x128xf32> -> vector<64x128xf32>
    %6 = vector.broadcast %4 : vector<64x1xf32> to vector<64x128xf32>
    %7 = arith.addf %5, %6 : vector<64x128xf32>
    %cst_6 = arith.constant 0.000000e+00 : f32
    %8 = vector.broadcast %cst_6 : f32 to vector<64x128xf32>
    %9 = arith.maximumf %7, %8 : vector<64x128xf32>
    %10 = arith.truncf %9 : vector<64x128xf32> to vector<64x128xbf16>
    %c0_7 = arith.constant 0 : index
    %c0_8 = arith.constant 0 : index
    %11 = vector.load %arg5[%c0_7, %c0_8] : memref<128x64xbf16, #tpu.memory_space<vmem>>, vector<128x64xbf16>
    %c0_9 = arith.constant 0 : index
    %c0_10 = arith.constant 0 : index
    %12 = vector.load %arg6[%c0_9, %c0_10] : memref<128x1xf32, #tpu.memory_space<vmem>>, vector<128x1xf32>
    %cst_11 = arith.constant dense<0.000000e+00> : vector<128x128xf32>
    %13 = tpu.matmul %11, %10, %cst_11 {dimension_numbers = #tpu.dot_dimension_numbers<[1], [0], [0], [1], [0, 0, 1, 1], [], []>} : vector<128x64xbf16>, vector<64x128xbf16>, vector<128x128xf32> -> vector<128x128xf32>
    %14 = vector.broadcast %12 : vector<128x1xf32> to vector<128x128xf32>
    %15 = arith.addf %13, %14 : vector<128x128xf32>
    %cst_12 = arith.constant 0.000000e+00 : f32
    %16 = vector.broadcast %cst_12 : f32 to vector<128x128xf32>
    %17 = arith.maximumf %15, %16 : vector<128x128xf32>
    %18 = arith.truncf %17 : vector<128x128xf32> to vector<128x128xbf16>
    %c0_13 = arith.constant 0 : index
    %c0_14 = arith.constant 0 : index
    %19 = vector.load %arg7[%c0_13, %c0_14] : memref<1024x128xbf16, #tpu.memory_space<vmem>>, vector<1024x128xbf16>
    %c0_15 = arith.constant 0 : index
    %c0_16 = arith.constant 0 : index
    %20 = vector.load %arg8[%c0_15, %c0_16] : memref<1024x1xf32, #tpu.memory_space<vmem>>, vector<1024x1xf32>
    %cst_17 = arith.constant dense<0.000000e+00> : vector<1024x128xf32>
    %21 = tpu.matmul %19, %18, %cst_17 {dimension_numbers = #tpu.dot_dimension_numbers<[1], [0], [0], [1], [0, 0, 1, 1], [], []>} : vector<1024x128xbf16>, vector<128x128xbf16>, vector<1024x128xf32> -> vector<1024x128xf32>
    %22 = vector.broadcast %20 : vector<1024x1xf32> to vector<1024x128xf32>
    %23 = arith.addf %21, %22 : vector<1024x128xf32>
    %cst_18 = arith.constant 0.000000e+00 : f32
    %24 = vector.broadcast %cst_18 : f32 to vector<1024x128xf32>
    %25 = arith.maximumf %23, %24 : vector<1024x128xf32>
    %cst_19 = arith.constant dense<0xFF800000> : vector<1024xf32>
    %26 = vector.multi_reduction <maximumf>, %25, %cst_19 [1] : vector<1024x128xf32> to vector<1024xf32>
    %27 = vector.shape_cast %26 : vector<1024xf32> to vector<1024x1xf32>
    %c0_i32 = arith.constant 0 : i32
    %28 = arith.cmpi eq, %arg1, %c0_i32 : i32
    %29 = arith.extui %28 : i1 to i32
    %c0_i32_20 = arith.constant 0 : i32
    %30 = arith.cmpi ne, %29, %c0_i32_20 : i32
    scf.if %30 {
      %c0_23 = arith.constant 0 : index
      %c0_24 = arith.constant 0 : index
      %c0_25 = arith.constant 0 : index
      %34 = vector.load %arg9[%c0_23, %c0_24, %c0_25] : memref<1x1024x1xf32, #tpu.memory_space<vmem>>, vector<1x1024x1xf32>
      %35 = vector.shape_cast %34 : vector<1x1024x1xf32> to vector<1024x1xf32>
      %36 = vector.shape_cast %27 : vector<1024x1xf32> to vector<1x1024x1xf32>
      tpu.vector_store %arg9[%c0_23, %c0_24, %c0_25], %36 {strides = array<i32>} : memref<1x1024x1xf32, #tpu.memory_space<vmem>>, vector<1x1024x1xf32>,
    } else {
    }
    %c0_i32_21 = arith.constant 0 : i32
    %31 = arith.cmpi sgt, %arg1, %c0_i32_21 : i32
    %32 = arith.extui %31 : i1 to i32
    %c0_i32_22 = arith.constant 0 : i32
    %33 = arith.cmpi ne, %32, %c0_i32_22 : i32
    scf.if %33 {
      %c0_23 = arith.constant 0 : index
      %c0_24 = arith.constant 0 : index
      %c0_25 = arith.constant 0 : index
      %34 = vector.load %arg9[%c0_23, %c0_24, %c0_25] : memref<1x1024x1xf32, #tpu.memory_space<vmem>>, vector<1x1024x1xf32>
      %35 = vector.shape_cast %34 : vector<1x1024x1xf32> to vector<1024x1xf32>
      %36 = arith.maximumf %35, %27 : vector<1024x1xf32>
      %c0_26 = arith.constant 0 : index
      %c0_27 = arith.constant 0 : index
      %c0_28 = arith.constant 0 : index
      %37 = vector.load %arg9[%c0_26, %c0_27, %c0_28] : memref<1x1024x1xf32, #tpu.memory_space<vmem>>, vector<1x1024x1xf32>
      %38 = vector.shape_cast %37 : vector<1x1024x1xf32> to vector<1024x1xf32>
      %39 = vector.shape_cast %36 : vector<1024x1xf32> to vector<1x1024x1xf32>
      tpu.vector_store %arg9[%c0_26, %c0_27, %c0_28], %39 {strides = array<i32>} : memref<1x1024x1xf32, #tpu.memory_space<vmem>>, vector<1x1024x1xf32>,
    } else {
    }
    return
  }
  func.func @transform_0(%arg0: i32, %arg1: i32) -> (i32, i32, i32) {
    %c0_i32 = arith.constant 0 : i32
    %c0_i32_0 = arith.constant 0 : i32
    return %arg0, %c0_i32, %arg1 : i32, i32, i32
  }
  func.func @transform_1(%arg0: i32, %arg1: i32) -> (i32, i32) {
    %c0_i32 = arith.constant 0 : i32
    %c0_i32_0 = arith.constant 0 : i32
    %c0_i32_1 = arith.constant 0 : i32
    return %c0_i32, %c0_i32_0 : i32, i32
  }
  func.func @transform_2(%arg0: i32, %arg1: i32) -> (i32, i32) {
    %c0_i32 = arith.constant 0 : i32
    %c0_i32_0 = arith.constant 0 : i32
    %c0_i32_1 = arith.constant 0 : i32
    return %c0_i32, %c0_i32_0 : i32, i32
  }
  func.func @transform_3(%arg0: i32, %arg1: i32) -> (i32, i32) {
    %c0_i32 = arith.constant 0 : i32
    %c0_i32_0 = arith.constant 0 : i32
    %c0_i32_1 = arith.constant 0 : i32
    return %c0_i32, %c0_i32_0 : i32, i32
  }
  func.func @transform_4(%arg0: i32, %arg1: i32) -> (i32, i32) {
    %c0_i32 = arith.constant 0 : i32
    %c0_i32_0 = arith.constant 0 : i32
    %c0_i32_1 = arith.constant 0 : i32
    return %c0_i32, %c0_i32_0 : i32, i32
  }
  func.func @transform_5(%arg0: i32, %arg1: i32) -> (i32, i32) {
    %c0_i32 = arith.constant 0 : i32
    %c0_i32_0 = arith.constant 0 : i32
    %c0_i32_1 = arith.constant 0 : i32
    return %c0_i32, %c0_i32_0 : i32, i32
  }
  func.func @transform_6(%arg0: i32, %arg1: i32) -> (i32, i32) {
    %c0_i32 = arith.constant 0 : i32
    %c0_i32_0 = arith.constant 0 : i32
    %c0_i32_1 = arith.constant 0 : i32
    return %c0_i32, %c0_i32_0 : i32, i32
  }
  func.func @transform_7(%arg0: i32, %arg1: i32) -> (i32, i32, i32) {
    %c0_i32 = arith.constant 0 : i32
    %c0_i32_0 = arith.constant 0 : i32
    %c0_i32_1 = arith.constant 0 : i32
    return %arg0, %c0_i32, %c0_i32_0 : i32, i32, i32
  }
}

</mosaic_0001>

<bundles_post_ra>
// kernel: tpu_custom_call.1
= control target key start
LH: loop header
LB: loop body
LE: loop exit
PB: predicated region body
PF: predicated region fallthrough
CT: control target
= control target key end

     0   :  { %s3788_s24 = smov 0   ;;  %s3790_s25 = smov 0   ;;  %s5400_s0 = inlined_call_operand.vmem [shape: f32[2,8,128], index: 0, kind: input, shape index: {}]   ;;  %s5401_s1 = inlined_call_operand.vmem [shape: bf16[64,8], index: 1, kind: input, shape index: {}]   ;;  %s5402_s2 = inlined_call_operand.vmem [shape: f32[64,1], index: 2, kind: input, shape index: {}]   ;;  %s5403_s3 = inlined_call_operand.vmem [shape: bf16[128,64], index: 3, kind: input, shape index: {}]   ;;  %s5404_s4 = inlined_call_operand.vmem [shape: f32[128,1], index: 4, kind: input, shape index: {}]   ;;  %s5405_s5 = inlined_call_operand.vmem [shape: bf16[1024,128], index: 5, kind: input, shape index: {}]   ;;  %s5406_s6 = inlined_call_operand.vmem [shape: f32[1024,1], index: 6, kind: input, shape index: {}]   ;;  %s5407_s7 = inlined_call_operand.vmem [shape: f32[2,1024,1], index: 7, kind: output, shape index: {}]  }
   0x1   :  { %s3792_s26 = smov 0  }
   0x2 LB: > { %s29_s27 = sadd.s32 1, %s3741_s25  ;;  %p3271_p0 = scmp.ge.s32.totalorder %s3745_s26, 1  ;;  %s3745_s26 = sphi %s3792_s26, %s17_s26   ;;  %s3741_s25 = sphi %s3790_s25, %s5503_s25   ;;  %s3737_s24 = sphi %s3788_s24, %s5502_s24  }
   0x3   : > { %p31_p1 = scmp.ge.s32.totalorder %s29_s27, 2  ;;  %p253_p2 = scmp.lt.s32.totalorder %s3745_s26, 3 }
   0x5   : > { %s5505_s27 = smov (%p31_p1, %s29_s27), 0  ;;  %p254_p3 = pnand %p3271_p0, %p253_p2 }
   0x7   : > { %257 = sbr.rel (%p254_p3) target bundleno = 1070 (0x42e), region = 48 }
   0xc   : > { %v314_v0 = vld [vmem:[%s5402_s2 + $0x20] sm:$0xff]  ;;  %v312_v1 = vld [vmem:[%s5402_s2 + $0x10] sm:$0xff]  ;;  %p287_p4 = scmp.lt.s32.totalorder %s3737_s24, 1  ;;  %v3747_v3 = vmov 0   ;;  %vm391_vm0 = vcmask 1043456   ;;  %v315_v5 = vld [vmem:[%s5402_s2 + $0x28] sm:$0xff] }
   0xd   : > { %v310_v2 = vld [vmem:[%s5402_s2] sm:$0xff]  ;;  %3722 = vset.pattern.permute.xlu2 %v3747_v3  ;;  %3721 = vset.pattern.permute.xlu1 %v3747_v3  ;;  %v313_v7 = vld [vmem:[%s5402_s2 + $0x18] sm:$0xff]  ;;  %v311_v8 = vld [vmem:[%s5402_s2 + $0x8] sm:$0xff]  ;;  %vm378_vm1 = vcmask 64512   ;;  %vm588_vm2 = vcmask 523264   ;;  %vm2683_vm3 = vcmask 7168  }
   0xe   : > { %3720 = vset.pattern.permute.xlu0 %v3747_v3  ;;  %340 = vperm.xlu2 %3722, %v314_v0   ;;  %s5507_s24 = smov (!%p287_p4, %s3737_s24), 1  ;;  %v3594_v10 = vld [vmem:[%s5401_s1] sm:$0xff]  ;;  %v3596_v11 = vld [vmem:[%s5401_s1 + $0x10] sm:$0xff]  ;;  %v317_v13 = vld [vmem:[%s5402_s2 + $0x38] sm:$0xff] }
   0xf   : > { %330 = vperm.xlu1 %3721, %v312_v1   ;;  %320 = vperm.xlu0 %3720, %v310_v2   ;;  %s3272_s11 = sshll.u32 %s5507_s24, 3  ;;  %v452_v12 = vld [vmem:[%s5404_s4] sm:$0xff]  ;;  %v316_v14 = vld [vmem:[%s5402_s2 + $0x30] sm:$0xff]  ;;  %v455_v15 = vld [vmem:[%s5404_s4 + $0x18] sm:$0xff] }
  0x10   : > { %s293_s14 = scalar_lea.vmem %s5400_s0, %s3272_s11  ;;  %v454_v16 = vld [vmem:[%s5404_s4 + $0x10] sm:$0xff]  ;;  %v453_v17 = vld [vmem:[%s5404_s4 + $0x8] sm:$0xff]  ;;  %v3597_v19 = vld [vmem:[%s5401_s1 + $0x18] sm:$0xff] }
  0x11   : > { %v300_v4 = vld [vmem:[%s293_s14] sm:$0xff]  ;;  %v3595_v18 = vld [vmem:[%s5401_s1 + $0x8] sm:$0xff]  ;;  %v458_v20 = vld [vmem:[%s5404_s4 + $0x30] sm:$0xff]  ;;  %s3593_s14 = sshll.u32 %s5507_s24, 10 }
  0x12   : > { %v301_v6 = vpack.c.bf16 %v300_v4, %v300_v4  ;;  %v457_v21 = vld [vmem:[%s5404_s4 + $0x28] sm:$0xff]  ;;  %v456_v22 = vld [vmem:[%s5404_s4 + $0x20] sm:$0xff]  ;;  %v459_v25 = vld [vmem:[%s5404_s4 + $0x38] sm:$0xff]  ;;  %s4885_s17 = scalar_lea.vmem %s5407_s7, %s3593_s14 }
  0x13   : > { %v461_v23 = vld [vmem:[%s5404_s4 + $0x48] sm:$0xff]  ;;  %v460_v24 = vld [vmem:[%s5404_s4 + $0x40] sm:$0xff]  ;;  %v463_v27 = vld [vmem:[%s5404_s4 + $0x58] sm:$0xff] }
  0x14   : > { %v393_v9 = vsel %vm391_vm0, %v301_v6, 0  ;;  %v464_v26 = vld [vmem:[%s5404_s4 + $0x60] sm:$0xff]  ;;  %v462_v28 = vld [vmem:[%s5404_s4 + $0x50] sm:$0xff]  ;;  %v467_v29 = vld [vmem:[%s5404_s4 + $0x78] sm:$0xff] }
  0x15   : > { %402 = vmatpush.bf16.msra.mxu0 %v393_v9  ;;  %3670 = vmatpush.bf16.msra.mxu1 %v393_v9  ;;  %v466_v30 = vld [vmem:[%s5404_s4 + $0x70] sm:$0xff]  ;;  %v465_v31 = vld [vmem:[%s5404_s4 + $0x68] sm:$0xff]  ;;  %v814_v34 = vld [vmem:[%s5406_s6] sm:$0xff] }
  0x16   : > { %345 = vperm.xlu2 %3722, %v315_v5   ;;  %v816_v32 = vld [vmem:[%s5406_s6 + $0x10] sm:$0xff]  ;;  %v815_v33 = vld [vmem:[%s5406_s6 + $0x8] sm:$0xff]  ;;  %v818_v36 = vld [vmem:[%s5406_s6 + $0x20] sm:$0xff] }
  0x17   : > { %335 = vperm.xlu1 %3721, %v313_v7   ;;  %325 = vperm.xlu0 %3720, %v311_v8   ;;  %v819_v35 = vld [vmem:[%s5406_s6 + $0x28] sm:$0xff]  ;;  %v817_v37 = vld [vmem:[%s5406_s6 + $0x18] sm:$0xff]  ;;  %v822_v38 = vld [vmem:[%s5406_s6 + $0x40] sm:$0xff] }
  0x18   : > { %3291 = vmatmul.msk.bf16.vlgmr.msra.gmra.mxu0 %vm378_vm1, %v3594_v10  ;;  %3293 = vmatmul.msk.bf16.vlgmr.msra.gmra.mxu1 %vm378_vm1, %v3596_v11  ;;  %v821_v39 = vld [vmem:[%s5406_s6 + $0x38] sm:$0xff]  ;;  %v820_v40 = vld [vmem:[%s5406_s6 + $0x30] sm:$0xff]  ;;  %v823_v43 = vld [vmem:[%s5406_s6 + $0x48] sm:$0xff] }
  0x19   : > { %v825_v41 = vld [vmem:[%s5406_s6 + $0x58] sm:$0xff]  ;;  %v824_v42 = vld [vmem:[%s5406_s6 + $0x50] sm:$0xff]  ;;  %v827_v45 = vld [vmem:[%s5406_s6 + $0x68] sm:$0xff] }
  0x1a   : > { %v828_v44 = vld [vmem:[%s5406_s6 + $0x70] sm:$0xff]  ;;  %v826_v46 = vld [vmem:[%s5406_s6 + $0x60] sm:$0xff]  ;;  %v831_v47 = vld [vmem:[%s5406_s6 + $0x88] sm:$0xff] }
  0x1b   : > { %v830_v48 = vld [vmem:[%s5406_s6 + $0x80] sm:$0xff]  ;;  %v829_v49 = vld [vmem:[%s5406_s6 + $0x78] sm:$0xff]  ;;  %v832_v52 = vld [vmem:[%s5406_s6 + $0x90] sm:$0xff] }
  0x1c   : > { %v834_v50 = vld [vmem:[%s5406_s6 + $0xa0] sm:$0xff]  ;;  %v833_v51 = vld [vmem:[%s5406_s6 + $0x98] sm:$0xff]  ;;  %v836_v54 = vld [vmem:[%s5406_s6 + $0xb0] sm:$0xff] }
  0x1d   : > { %v837_v53 = vld [vmem:[%s5406_s6 + $0xb8] sm:$0xff]  ;;  %v835_v55 = vld [vmem:[%s5406_s6 + $0xa8] sm:$0xff]  ;;  %v840_v56 = vld [vmem:[%s5406_s6 + $0xd0] sm:$0xff] }
  0x1e   : > { %470 = vperm.xlu2 %3722, %v452_v12   ;;  %v839_v57 = vld [vmem:[%s5406_s6 + $0xc8] sm:$0xff]  ;;  %v838_v58 = vld [vmem:[%s5406_s6 + $0xc0] sm:$0xff]  ;;  %v841_v61 = vld [vmem:[%s5406_s6 + $0xd8] sm:$0xff] }
  0x1f   : > { %355 = vperm.xlu1 %3721, %v317_v13   ;;  %350 = vperm.xlu0 %3720, %v316_v14   ;;  %v843_v59 = vld [vmem:[%s5406_s6 + $0xe8] sm:$0xff]  ;;  %v842_v60 = vld [vmem:[%s5406_s6 + $0xe0] sm:$0xff]  ;;  %v845_v3 = vld [vmem:[%s5406_s6 + $0xf8] sm:$0xff] }
  0x20   : > { %v846_v1 = vld [vmem:[%s5406_s6 + $0x100] sm:$0xff]  ;;  %v844_v4 = vld [vmem:[%s5406_s6 + $0xf0] sm:$0xff]  ;;  %v849_v7 = vld [vmem:[%s5406_s6 + $0x118] sm:$0xff] }
  0x21   : > { %v848_v9 = vld [vmem:[%s5406_s6 + $0x110] sm:$0xff]  ;;  %v847_v10 = vld [vmem:[%s5406_s6 + $0x108] sm:$0xff] }
  0x26   : > { %485 = vperm.xlu2 %3722, %v455_v15   ;;  %v852_v15 = vld [vmem:[%s5406_s6 + $0x130] sm:$0xff] }
  0x27   : > { %480 = vperm.xlu1 %3721, %v454_v16   ;;  %475 = vperm.xlu0 %3720, %v453_v17   ;;  %v851_v16 = vld [vmem:[%s5406_s6 + $0x128] sm:$0xff]  ;;  %v850_v17 = vld [vmem:[%s5406_s6 + $0x120] sm:$0xff] }
  0x28   : > { %3292 = vmatmul.msk.bf16.gmra.mxu0 %vm378_vm1, %v3595_v18  ;;  %3294 = vmatmul.msk.bf16.gmra.mxu1 %vm378_vm1, %v3597_v19 }
  0x2e   : > { %500 = vperm.xlu2 %3722, %v458_v20  }
  0x2f   : > { %495 = vperm.xlu1 %3721, %v457_v21   ;;  %490 = vperm.xlu0 %3720, %v456_v22  }
  0x36   : > { %515 = vperm.xlu2 %3722, %v461_v23  }
  0x37   : > { %510 = vperm.xlu1 %3721, %v460_v24   ;;  %505 = vperm.xlu0 %3720, %v459_v25  }
  0x3e   : > { %530 = vperm.xlu2 %3722, %v464_v26  }
  0x3f   : > { %525 = vperm.xlu1 %3721, %v463_v27   ;;  %520 = vperm.xlu0 %3720, %v462_v28  }
  0x46   : > { %545 = vperm.xlu2 %3722, %v467_v29   ;;  %v855_v29 = vld [vmem:[%s5406_s6 + $0x148] sm:$0xff] }
  0x47   : > { %540 = vperm.xlu1 %3721, %v466_v30   ;;  %535 = vperm.xlu0 %3720, %v465_v31   ;;  %v854_v30 = vld [vmem:[%s5406_s6 + $0x140] sm:$0xff] }
  0x4e   : > { %954 = vperm.xlu2 %3722, %v816_v32  }
  0x4f   : > { %949 = vperm.xlu1 %3721, %v815_v33   ;;  %944 = vperm.xlu0 %3720, %v814_v34   ;;  %v853_v34 = vld [vmem:[%s5406_s6 + $0x138] sm:$0xff] }
  0x56   : > { %969 = vperm.xlu2 %3722, %v819_v35  }
  0x57   : > { %964 = vperm.xlu1 %3721, %v818_v36   ;;  %959 = vperm.xlu0 %3720, %v817_v37  }
  0x5e   : > { %984 = vperm.xlu2 %3722, %v822_v38  }
  0x5f   : > { %979 = vperm.xlu1 %3721, %v821_v39   ;;  %974 = vperm.xlu0 %3720, %v820_v40  }
  0x66   : > { %999 = vperm.xlu2 %3722, %v825_v41  }
  0x67   : > { %994 = vperm.xlu1 %3721, %v824_v42   ;;  %989 = vperm.xlu0 %3720, %v823_v43   ;;  %v858_v42 = vld [vmem:[%s5406_s6 + $0x160] sm:$0xff]  ;;  %v857_v43 = vld [vmem:[%s5406_s6 + $0x158] sm:$0xff] }
  0x68   : > { %v341_v11 = vpop.permute.xlu2 %340 }
  0x6e   : > { %1014 = vperm.xlu2 %3722, %v828_v44  }
  0x6f   : > { %1009 = vperm.xlu1 %3721, %v827_v45   ;;  %1004 = vperm.xlu0 %3720, %v826_v46  }
  0x70   : > { %v346_v19 = vpop.permute.xlu2 %345 }
  0x76   : > { %1029 = vperm.xlu2 %3722, %v831_v47   ;;  %v856_v47 = vld [vmem:[%s5406_s6 + $0x150] sm:$0xff] }
  0x77   : > { %1024 = vperm.xlu1 %3721, %v830_v48   ;;  %1019 = vperm.xlu0 %3720, %v829_v49   ;;  %v3598_v49 = vld [vmem:[%s5403_s3] sm:$0xff] }
  0x7e   : > { %1044 = vperm.xlu2 %3722, %v834_v50   ;;  %v861_v50 = vld [vmem:[%s5406_s6 + $0x178] sm:$0xff] }
  0x7f   : > { %1039 = vperm.xlu1 %3721, %v833_v51   ;;  %1034 = vperm.xlu0 %3720, %v832_v52   ;;  %v860_v51 = vld [vmem:[%s5406_s6 + $0x170] sm:$0xff]  ;;  %v859_v52 = vld [vmem:[%s5406_s6 + $0x168] sm:$0xff] }
  0x81   : > { %v321_v0 = vpop.permute.xlu0 %320  ;;  %v331_v2 = vpop.permute.xlu1 %330 }
  0x86   : > { %1059 = vperm.xlu2 %3722, %v837_v53   ;;  %v864_v53 = vld [vmem:[%s5406_s6 + $0x190] sm:$0xff] }
  0x87   : > { %1054 = vperm.xlu1 %3721, %v836_v54   ;;  %1049 = vperm.xlu0 %3720, %v835_v55   ;;  %v863_v54 = vld [vmem:[%s5406_s6 + $0x188] sm:$0xff]  ;;  %v862_v55 = vld [vmem:[%s5406_s6 + $0x180] sm:$0xff] }
  0x89   : > { %v326_v8 = vpop.permute.xlu0 %325  ;;  %v336_v12 = vpop.permute.xlu1 %335 }
  0x8e   : > { %1074 = vperm.xlu2 %3722, %v840_v56   ;;  %v3599_v56 = vld [vmem:[%s5403_s3 + $0x8] sm:$0xff] }
  0x8f   : > { %1069 = vperm.xlu1 %3721, %v839_v57   ;;  %1064 = vperm.xlu0 %3720, %v838_v58   ;;  %v867_v57 = vld [vmem:[%s5406_s6 + $0x1a8] sm:$0xff]  ;;  %v866_v58 = vld [vmem:[%s5406_s6 + $0x1a0] sm:$0xff] }
  0x91   : > { %v351_v18 = vpop.permute.xlu0 %350  ;;  %v356_v21 = vpop.permute.xlu1 %355 }
  0x95   : > { %v404_v62 = vpop.f32.mrf.mxu0  ;;  %v414_v63 = vpop.f32.mrf.mxu1 }
  0x96   : > { %1089 = vperm.xlu2 %3722, %v843_v59   ;;  %v415_v26 = vadd.f32 %v414_v63, %v341_v11  ;;  %v405_v37 = vadd.f32 %v404_v62, %v321_v0  ;;  %v865_v59 = vld [vmem:[%s5406_s6 + $0x198] sm:$0xff]  ;;  %v868_v62 = vld [vmem:[%s5406_s6 + $0x1b0] sm:$0xff] }
  0x97   : > { %1084 = vperm.xlu1 %3721, %v842_v60   ;;  %1079 = vperm.xlu0 %3720, %v841_v61   ;;  %v870_v60 = vld [vmem:[%s5406_s6 + $0x1c0] sm:$0xff]  ;;  %v869_v61 = vld [vmem:[%s5406_s6 + $0x1b8] sm:$0xff]  ;;  %v3600_v63 = vld [vmem:[%s5403_s3 + $0x10] sm:$0xff] }
  0x98   : > { %v428_v35 = vmax.f32 %v415_v26, 0.0  ;;  %v424_v44 = vmax.f32 %v405_v37, 0.0  ;;  %v873_v0 = vld [vmem:[%s5406_s6 + $0x1d8] sm:$0xff]  ;;  %v887_v26 = vld [vmem:[%s5406_s6 + $0x248] sm:$0xff] }
  0x99   : > { %v4116_v11 = vpop.permute.xlu1 %480 }
  0x9d   : > { %v406_v5 = vpop.f32.mrf.mxu0  ;;  %v416_v6 = vpop.f32.mrf.mxu1 }
  0x9e   : > { %1104 = vperm.xlu2 %3722, %v846_v1   ;;  %v417_v23 = vadd.f32 %v416_v6, %v346_v19  ;;  %v407_v38 = vadd.f32 %v406_v5, %v326_v8  ;;  %v872_v1 = vld [vmem:[%s5406_s6 + $0x1d0] sm:$0xff]  ;;  %v874_v5 = vld [vmem:[%s5406_s6 + $0x1e0] sm:$0xff]  ;;  %v3601_v6 = vld [vmem:[%s5403_s3 + $0x18] sm:$0xff] }
  0x9f   : > { %1099 = vperm.xlu1 %3721, %v845_v3   ;;  %1094 = vperm.xlu0 %3720, %v844_v4   ;;  %v876_v3 = vld [vmem:[%s5406_s6 + $0x1f0] sm:$0xff]  ;;  %v875_v4 = vld [vmem:[%s5406_s6 + $0x1e8] sm:$0xff]  ;;  %v878_v8 = vld [vmem:[%s5406_s6 + $0x200] sm:$0xff] }
  0xa0   : > { %v429_v31 = vmax.f32 %v417_v23, 0.0  ;;  %v425_v45 = vmax.f32 %v407_v38, 0.0  ;;  %v885_v19 = vld [vmem:[%s5406_s6 + $0x238] sm:$0xff]  ;;  %v888_v23 = vld [vmem:[%s5406_s6 + $0x250] sm:$0xff] }
  0xa1   : > { %v892_v38 = vld [vmem:[%s5406_s6 + $0x270] sm:$0xff] }
  0xa2   : > { %v434_v40 = vpack.c.bf16 %v429_v31, %v428_v35  ;;  %v432_v48 = vpack.c.bf16 %v425_v45, %v424_v44  ;;  %v890_v31 = vld [vmem:[%s5406_s6 + $0x260] sm:$0xff]  ;;  %v895_v44 = vld [vmem:[%s5406_s6 + $0x288] sm:$0xff] }
  0xa3   : > { %v894_v35 = vld [vmem:[%s5406_s6 + $0x280] sm:$0xff] }
  0xa5   : > { %v409_v13 = vpop.f32.mrf.mxu0  ;;  %v419_v14 = vpop.f32.mrf.mxu1 }
  0xa6   : > { %1119 = vperm.xlu2 %3722, %v849_v7   ;;  %v420_v20 = vadd.f32 %v419_v14, %v351_v18  ;;  %v410_v36 = vadd.f32 %v409_v13, %v331_v2  ;;  %v871_v2 = vld [vmem:[%s5406_s6 + $0x1c8] sm:$0xff]  ;;  %v881_v13 = vld [vmem:[%s5406_s6 + $0x218] sm:$0xff]  ;;  %v880_v14 = vld [vmem:[%s5406_s6 + $0x210] sm:$0xff] }
  0xa7   : > { %1114 = vperm.xlu1 %3721, %v848_v9   ;;  %1109 = vperm.xlu0 %3720, %v847_v10   ;;  %v879_v7 = vld [vmem:[%s5406_s6 + $0x208] sm:$0xff]  ;;  %v877_v9 = vld [vmem:[%s5406_s6 + $0x1f8] sm:$0xff]  ;;  %v4114_v10 = vpop.permute.xlu2 %470  ;;  %v3602_v18 = vld [vmem:[%s5403_s3 + $0x20] sm:$0xff] }
  0xa8   : > { %v430_v27 = vmax.f32 %v420_v20, 0.0  ;;  %v426_v41 = vmax.f32 %v410_v36, 0.0  ;;  %v884_v20 = vld [vmem:[%s5406_s6 + $0x230] sm:$0xff]  ;;  %v893_v36 = vld [vmem:[%s5406_s6 + $0x278] sm:$0xff] }
  0xad   : > { %v421_v22 = vpop.f32.mrf.mxu1  ;;  %v411_v25 = vpop.f32.mrf.mxu0 }
  0xae   : > { %1134 = vperm.xlu2 %3722, %v852_v15   ;;  %v422_v24 = vadd.f32 %v421_v22, %v356_v21  ;;  %v412_v32 = vadd.f32 %v411_v25, %v336_v12  ;;  %v882_v12 = vld [vmem:[%s5406_s6 + $0x220] sm:$0xff]  ;;  %v4127_v15 = vpop.permute.xlu0 %475  ;;  %v883_v21 = vld [vmem:[%s5406_s6 + $0x228] sm:$0xff] }
  0xaf   : > { %1129 = vperm.xlu1 %3721, %v851_v16   ;;  %1124 = vperm.xlu0 %3720, %v850_v17   ;;  %v4129_v16 = vpop.permute.xlu2 %485  ;;  %v4131_v17 = vpop.permute.xlu1 %495 }
  0xb0   : > { %v431_v28 = vmax.f32 %v422_v24, 0.0  ;;  %v427_v39 = vmax.f32 %v412_v32, 0.0  ;;  %v889_v32 = vld [vmem:[%s5406_s6 + $0x258] sm:$0xff] }
  0xb2   : > { %v435_v33 = vpack.c.bf16 %v431_v28, %v430_v27  ;;  %v433_v46 = vpack.c.bf16 %v427_v39, %v426_v41  ;;  %v886_v27 = vld [vmem:[%s5406_s6 + $0x240] sm:$0xff]  ;;  %v3603_v28 = vld [vmem:[%s5403_s3 + $0x28] sm:$0xff]  ;;  %v3604_v41 = vld [vmem:[%s5403_s3 + $0x30] sm:$0xff] }
  0xb4   : > { %617 = vmatpush.bf16.msrb.mxu1 %v435_v33 }
  0xb6   : > { %1149 = vperm.xlu2 %3722, %v855_v29   ;;  %v4146_v22 = vpop.permute.xlu0 %490 }
  0xb7   : > { %1144 = vperm.xlu1 %3721, %v854_v30   ;;  %1139 = vperm.xlu0 %3720, %v853_v34   ;;  %v4151_v24 = vpop.permute.xlu2 %500  ;;  %v4153_v25 = vpop.permute.xlu1 %510  ;;  %v891_v30 = vld [vmem:[%s5406_s6 + $0x268] sm:$0xff] }
  0xb8   : > { %618 = vmatpush.bf16.msrb.mxu1 %v434_v40 }
  0xbc   : > { %619 = vmatpush.bf16.msrb.mxu1 %v433_v46 }
  0xbe   : > { %1164 = vperm.xlu2 %3722, %v858_v42   ;;  %v4164_v29 = vpop.permute.xlu0 %505  ;;  %v897_v42 = vld [vmem:[%s5406_s6 + $0x298] sm:$0xff] }
  0xbf   : > { %1159 = vperm.xlu1 %3721, %v857_v43   ;;  %1154 = vperm.xlu0 %3720, %v856_v47   ;;  %v4175_v33 = vpop.permute.xlu2 %515  ;;  %v4177_v34 = vpop.permute.xlu1 %525  ;;  %v896_v43 = vld [vmem:[%s5406_s6 + $0x290] sm:$0xff] }
  0xc0   : > { %620 = vmatpush.bf16.msrb.mxu1 %v432_v48  ;;  %v900_v48 = vld [vmem:[%s5406_s6 + $0x2b0] sm:$0xff] }
  0xc3   : > { %3327 = vmatmul.msk.bf16.vlgmr.msrb.gmra.mxu1 %vm588_vm2, %v3598_v49  ;;  %v899_v49 = vld [vmem:[%s5406_s6 + $0x2a8] sm:$0xff] }
  0xc6   : > { %1179 = vperm.xlu2 %3722, %v861_v50   ;;  %v4186_v37 = vpop.permute.xlu0 %520  ;;  %v898_v50 = vld [vmem:[%s5406_s6 + $0x2a0] sm:$0xff] }
  0xc7   : > { %1174 = vperm.xlu1 %3721, %v860_v51   ;;  %1169 = vperm.xlu0 %3720, %v859_v52   ;;  %v4191_v39 = vpop.permute.xlu2 %530  ;;  %v4193_v40 = vpop.permute.xlu1 %540  ;;  %v3605_v52 = vld [vmem:[%s5403_s3 + $0x38] sm:$0xff] }
  0xce   : > { %1194 = vperm.xlu2 %3722, %v864_v53   ;;  %v4208_v45 = vpop.permute.xlu0 %535  ;;  %v903_v53 = vld [vmem:[%s5406_s6 + $0x2c8] sm:$0xff] }
  0xcf   : > { %1189 = vperm.xlu1 %3721, %v863_v54   ;;  %1184 = vperm.xlu0 %3720, %v862_v55   ;;  %v4210_v46 = vpop.permute.xlu2 %545  ;;  %v4212_v47 = vpop.permute.xlu1 %949 }
  0xd3   : > { %3328 = vmatmul.msk.bf16.gmra.mxu1 %vm588_vm2, %v3599_v56  ;;  %v902_v56 = vld [vmem:[%s5406_s6 + $0x2c0] sm:$0xff] }
  0xd6   : > { %1209 = vperm.xlu2 %3722, %v867_v57   ;;  %v4223_v51 = vpop.permute.xlu0 %944  ;;  %v901_v57 = vld [vmem:[%s5406_s6 + $0x2b8] sm:$0xff] }
  0xd7   : > { %1204 = vperm.xlu1 %3721, %v866_v58   ;;  %1199 = vperm.xlu0 %3720, %v865_v59   ;;  %v4231_v54 = vpop.permute.xlu2 %954  ;;  %v4233_v55 = vpop.permute.xlu1 %964  ;;  %v906_v59 = vld [vmem:[%s5406_s6 + $0x2e0] sm:$0xff] }
  0xde   : > { %1224 = vperm.xlu2 %3722, %v870_v60   ;;  %v4242_v58 = vpop.permute.xlu0 %959  ;;  %v905_v60 = vld [vmem:[%s5406_s6 + $0x2d8] sm:$0xff] }
  0xdf   : > { %1219 = vperm.xlu1 %3721, %v869_v61   ;;  %1214 = vperm.xlu0 %3720, %v868_v62   ;;  %v904_v61 = vld [vmem:[%s5406_s6 + $0x2d0] sm:$0xff]  ;;  %v4253_v62 = vpop.permute.xlu2 %969 }
  0xe3   : > { %3329 = vmatmul.msk.bf16.gmra.mxu1 %vm588_vm2, %v3600_v63  ;;  %v4255_v63 = vpop.permute.xlu1 %979 }
  0xe6   : > { %1239 = vperm.xlu2 %3722, %v873_v0  }
  0xe7   : > { %1234 = vperm.xlu1 %3721, %v872_v1   ;;  %1229 = vperm.xlu0 %3720, %v871_v2   ;;  %v909_v1 = vld [vmem:[%s5406_s6 + $0x2f8] sm:$0xff]  ;;  %v908_v2 = vld [vmem:[%s5406_s6 + $0x2f0] sm:$0xff] }
  0xee   : > { %1254 = vperm.xlu2 %3722, %v876_v3   ;;  %v4265_v3 = vpop.permute.xlu0 %974 }
  0xef   : > { %1249 = vperm.xlu1 %3721, %v875_v4   ;;  %1244 = vperm.xlu0 %3720, %v874_v5   ;;  %v907_v4 = vld [vmem:[%s5406_s6 + $0x2e8] sm:$0xff]  ;;  %v4270_v5 = vpop.permute.xlu2 %984 }
  0xf3   : > { %3330 = vmatmul.msk.bf16.gmra.mxu1 %vm588_vm2, %v3601_v6  ;;  %v4272_v6 = vpop.permute.xlu1 %994 }
  0xf4   : > { %5408 = vst [vmem:[#allocation2_spill] sm:$0xff] %v4272_v6 }
  0xf6   : > { %1269 = vperm.xlu2 %3722, %v879_v7  }
  0xf7   : > { %1264 = vperm.xlu1 %3721, %v878_v8   ;;  %1259 = vperm.xlu0 %3720, %v877_v9   ;;  %v912_v8 = vld [vmem:[%s5406_s6 + $0x310] sm:$0xff]  ;;  %v911_v9 = vld [vmem:[%s5406_s6 + $0x308] sm:$0xff] }
  0xfe   : > { %1284 = vperm.xlu2 %3722, %v882_v12   ;;  %v910_v12 = vld [vmem:[%s5406_s6 + $0x300] sm:$0xff] }
  0xff   : > { %1279 = vperm.xlu1 %3721, %v881_v13   ;;  %1274 = vperm.xlu0 %3720, %v880_v14   ;;  %v4285_v13 = vpop.permute.xlu0 %989  ;;  %v4287_v14 = vpop.permute.xlu2 %999 }
 0x103   : > { %3331 = vmatmul.msk.bf16.gmra.mxu1 %vm588_vm2, %v3602_v18  ;;  %v4289_v18 = vpop.permute.xlu1 %1009 }
 0x104   : > { %5409 = vst [vmem:[#allocation3_spill] sm:$0xff] %v4289_v18 }
 0x106   : > { %1299 = vperm.xlu2 %3722, %v885_v19  }
 0x107   : > { %1294 = vperm.xlu1 %3721, %v884_v20   ;;  %1289 = vperm.xlu0 %3720, %v883_v21   ;;  %v915_v20 = vld [vmem:[%s5406_s6 + $0x328] sm:$0xff]  ;;  %v914_v21 = vld [vmem:[%s5406_s6 + $0x320] sm:$0xff] }
 0x10e   : > { %1314 = vperm.xlu2 %3722, %v888_v23   ;;  %v913_v23 = vld [vmem:[%s5406_s6 + $0x318] sm:$0xff] }
 0x10f   : > { %1309 = vperm.xlu1 %3721, %v887_v26   ;;  %1304 = vperm.xlu0 %3720, %v886_v27   ;;  %v4302_v26 = vpop.permute.xlu0 %1004 }
 0x110   : > { %5410 = vst [vmem:[#allocation4_spill] sm:$0xff] %v4302_v26 }
 0x113   : > { %3332 = vmatmul.msk.bf16.gmra.mxu1 %vm588_vm2, %v3603_v28  ;;  %v918_v28 = vld [vmem:[%s5406_s6 + $0x340] sm:$0xff] }
 0x116   : > { %1329 = vperm.xlu2 %3722, %v891_v30   ;;  %v4309_v30 = vpop.permute.xlu2 %1014 }
 0x117   : > { %1324 = vperm.xlu1 %3721, %v890_v31   ;;  %1319 = vperm.xlu0 %3720, %v889_v32   ;;  %5411 = vst [vmem:[#allocation5_spill] sm:$0xff] %v4309_v30  ;;  %v4311_v31 = vpop.permute.xlu1 %1024  ;;  %v917_v32 = vld [vmem:[%s5406_s6 + $0x338] sm:$0xff] }
 0x118   : > { %5412 = vst [vmem:[#allocation6_spill] sm:$0xff] %v4311_v31 }
 0x11e   : > { %1344 = vperm.xlu2 %3722, %v894_v35   ;;  %v916_v35 = vld [vmem:[%s5406_s6 + $0x330] sm:$0xff] }
 0x11f   : > { %1339 = vperm.xlu1 %3721, %v893_v36   ;;  %1334 = vperm.xlu0 %3720, %v892_v38   ;;  %v4319_v36 = vpop.permute.xlu0 %1019 }
 0x120   : > { %5413 = vst [vmem:[#allocation7_spill] sm:$0xff] %v4319_v36 }
 0x123   : > { %3333 = vmatmul.msk.bf16.gmra.mxu1 %vm588_vm2, %v3604_v41  ;;  %v921_v41 = vld [vmem:[%s5406_s6 + $0x358] sm:$0xff] }
 0x126   : > { %1359 = vperm.xlu2 %3722, %v897_v42   ;;  %v920_v42 = vld [vmem:[%s5406_s6 + $0x350] sm:$0xff] }
 0x127   : > { %1354 = vperm.xlu1 %3721, %v896_v43   ;;  %1349 = vperm.xlu0 %3720, %v895_v44   ;;  %v919_v43 = vld [vmem:[%s5406_s6 + $0x348] sm:$0xff]  ;;  %v4332_v44 = vpop.permute.xlu2 %1029 }
 0x128   : > { %5414 = vst [vmem:[#allocation8_spill] sm:$0xff] %v4332_v44 }
 0x12e   : > { %1374 = vperm.xlu2 %3722, %v900_v48   ;;  %v4334_v48 = vpop.permute.xlu1 %1039 }
 0x12f   : > { %1369 = vperm.xlu1 %3721, %v899_v49   ;;  %1364 = vperm.xlu0 %3720, %v898_v50   ;;  %5415 = vst [vmem:[#allocation9_spill] sm:$0xff] %v4334_v48  ;;  %v924_v50 = vld [vmem:[%s5406_s6 + $0x370] sm:$0xff] }
 0x133   : > { %3334 = vmatmul.msk.bf16.gmra.mxu1 %vm588_vm2, %v3605_v52  ;;  %v923_v52 = vld [vmem:[%s5406_s6 + $0x368] sm:$0xff] }
 0x136   : > { %1389 = vperm.xlu2 %3722, %v903_v53   ;;  %v4344_v53 = vpop.permute.xlu0 %1034 }
 0x137   : > { %1384 = vperm.xlu1 %3721, %v902_v56   ;;  %1379 = vperm.xlu0 %3720, %v901_v57   ;;  %5416 = vst [vmem:[#allocation10_spill] sm:$0xff] %v4344_v53  ;;  %v922_v56 = vld [vmem:[%s5406_s6 + $0x360] sm:$0xff]  ;;  %v4349_v57 = vpop.permute.xlu2 %1044 }
 0x138   : > { %5417 = vst [vmem:[#allocation11_spill] sm:$0xff] %v4349_v57 }
 0x13e   : > { %1404 = vperm.xlu2 %3722, %v906_v59   ;;  %v4351_v59 = vpop.permute.xlu1 %1054 }
 0x13f   : > { %1399 = vperm.xlu1 %3721, %v905_v60   ;;  %1394 = vperm.xlu0 %3720, %v904_v61   ;;  %5418 = vst [vmem:[#allocation12_spill] sm:$0xff] %v4351_v59  ;;  %v927_v61 = vld [vmem:[%s5406_s6 + $0x388] sm:$0xff] }
 0x140   : > { %v4257_v0 = vpop.f32.mrf.mxu1 }
 0x146   : > { %1419 = vperm.xlu2 %3722, %v909_v1   ;;  %v926_v1 = vld [vmem:[%s5406_s6 + $0x380] sm:$0xff] }
 0x147   : > { %1414 = vperm.xlu1 %3721, %v908_v2   ;;  %1409 = vperm.xlu0 %3720, %v907_v4   ;;  %v925_v2 = vld [vmem:[%s5406_s6 + $0x378] sm:$0xff]  ;;  %v4364_v4 = vpop.permute.xlu0 %1049 }
 0x148   : > { %v4274_v7 = vpop.f32.mrf.mxu1  ;;  %5419 = vst [vmem:[#allocation13_spill] sm:$0xff] %v4364_v4 }
 0x14e   : > { %1434 = vperm.xlu2 %3722, %v912_v8   ;;  %v4366_v8 = vpop.permute.xlu2 %1059 }
 0x14f   : > { %1429 = vperm.xlu1 %3721, %v911_v9   ;;  %1424 = vperm.xlu0 %3720, %v910_v12   ;;  %5420 = vst [vmem:[#allocation14_spill] sm:$0xff] %v4366_v8  ;;  %v4368_v9 = vpop.permute.xlu1 %1069 }
 0x150   : > { %v4291_v19 = vpop.f32.mrf.mxu1  ;;  %5421 = vst [vmem:[#allocation15_spill] sm:$0xff] %v4368_v9 }
 0x156   : > { %1449 = vperm.xlu2 %3722, %v915_v20   ;;  %v930_v20 = vld [vmem:[%s5406_s6 + $0x3a0] sm:$0xff] }
 0x157   : > { %1444 = vperm.xlu1 %3721, %v914_v21   ;;  %1439 = vperm.xlu0 %3720, %v913_v23   ;;  %v929_v21 = vld [vmem:[%s5406_s6 + $0x398] sm:$0xff]  ;;  %v928_v23 = vld [vmem:[%s5406_s6 + $0x390] sm:$0xff] }
 0x158   : > { %v4304_v27 = vpop.f32.mrf.mxu1 }
 0x15e   : > { %1464 = vperm.xlu2 %3722, %v918_v28   ;;  %v4381_v28 = vpop.permute.xlu0 %1064 }
 0x15f   : > { %1459 = vperm.xlu1 %3721, %v917_v32   ;;  %1454 = vperm.xlu0 %3720, %v916_v35   ;;  %5422 = vst [vmem:[#allocation16_spill] sm:$0xff] %v4381_v28  ;;  %v933_v35 = vld [vmem:[%s5406_s6 + $0x3b8] sm:$0xff] }
 0x160   : > { %v4321_v38 = vpop.f32.mrf.mxu1 }
 0x166   : > { %1479 = vperm.xlu2 %3722, %v921_v41   ;;  %v4388_v41 = vpop.permute.xlu2 %1074 }
 0x167   : > { %1474 = vperm.xlu1 %3721, %v920_v42   ;;  %1469 = vperm.xlu0 %3720, %v919_v43   ;;  %5423 = vst [vmem:[#allocation17_spill] sm:$0xff] %v4388_v41  ;;  %v4390_v42 = vpop.permute.xlu1 %1084  ;;  %v932_v43 = vld [vmem:[%s5406_s6 + $0x3b0] sm:$0xff] }
 0x168   : > { %v4336_v49 = vpop.f32.mrf.mxu1  ;;  %5424 = vst [vmem:[#allocation18_spill] sm:$0xff] %v4390_v42  ;;  %v937_v42 = vld [vmem:[%s5406_s6 + $0x3d8] sm:$0xff] }
 0x16e   : > { %1494 = vperm.xlu2 %3722, %v924_v50   ;;  %v931_v50 = vld [vmem:[%s5406_s6 + $0x3a8] sm:$0xff] }
 0x16f   : > { %1489 = vperm.xlu1 %3721, %v923_v52   ;;  %1484 = vperm.xlu0 %3720, %v922_v56   ;;  %v4398_v52 = vpop.permute.xlu0 %1079 }
 0x170   : > { %v4353_v60 = vpop.f32.mrf.mxu1  ;;  %5425 = vst [vmem:[#allocation19_spill] sm:$0xff] %v4398_v52 }
 0x176   : > { %1509 = vperm.xlu2 %3722, %v927_v61   ;;  %v936_v61 = vld [vmem:[%s5406_s6 + $0x3d0] sm:$0xff] }
 0x177   : > { %1504 = vperm.xlu1 %3721, %v926_v1   ;;  %1499 = vperm.xlu0 %3720, %v925_v2   ;;  %v935_v1 = vld [vmem:[%s5406_s6 + $0x3c8] sm:$0xff]  ;;  %v934_v2 = vld [vmem:[%s5406_s6 + $0x3c0] sm:$0xff] }
 0x178   : > { %v4370_v12 = vpop.f32.mrf.mxu1 }
 0x17e   : > { %1524 = vperm.xlu2 %3722, %v930_v20   ;;  %v4409_v20 = vpop.permute.xlu2 %1089 }
 0x17f   : > { %1519 = vperm.xlu1 %3721, %v929_v21   ;;  %1514 = vperm.xlu0 %3720, %v928_v23   ;;  %5426 = vst [vmem:[#allocation20_spill] sm:$0xff] %v4409_v20  ;;  %v4411_v21 = vpop.permute.xlu1 %1099 }
 0x180   : > { %v4383_v32 = vpop.f32.mrf.mxu1  ;;  %5427 = vst [vmem:[#allocation21_spill] sm:$0xff] %v4411_v21  ;;  %v941_v21 = vld [vmem:[%s5406_s6 + $0x3f8] sm:$0xff] }
 0x186   : > { %1539 = vperm.xlu2 %3722, %v933_v35   ;;  %v939_v35 = vld [vmem:[%s5406_s6 + $0x3e8] sm:$0xff] }
 0x187   : > { %1534 = vperm.xlu1 %3721, %v932_v43   ;;  %1529 = vperm.xlu0 %3720, %v931_v50   ;;  %v938_v43 = vld [vmem:[%s5406_s6 + $0x3e0] sm:$0xff]  ;;  %v4419_v50 = vpop.permute.xlu0 %1094 }
 0x188   : > { %v644_v56 = vpop.f32.mrf.mxu1  ;;  %5428 = vst [vmem:[#allocation22_spill] sm:$0xff] %v4419_v50  ;;  %v940_v50 = vld [vmem:[%s5406_s6 + $0x3f0] sm:$0xff] }
 0x18e   : > { %1554 = vperm.xlu2 %3722, %v936_v61   ;;  %v4424_v61 = vpop.permute.xlu2 %1104 }
 0x18f   : > { %1549 = vperm.xlu1 %3721, %v935_v1   ;;  %1544 = vperm.xlu0 %3720, %v934_v2   ;;  %5429 = vst [vmem:[#allocation23_spill] sm:$0xff] %v4424_v61  ;;  %v4426_v1 = vpop.permute.xlu1 %1114  ;;  %v4434_v20 = vpop.permute.xlu0 %1109 }
 0x190   : > { %v647_v23 = vpop.f32.mrf.mxu1  ;;  %5430 = vst [vmem:[#allocation24_spill] sm:$0xff] %v4434_v20 }
 0x196   : > { %1569 = vperm.xlu2 %3722, %v939_v35   ;;  %v4436_v35 = vpop.permute.xlu2 %1119 }
 0x197   : > { %1564 = vperm.xlu1 %3721, %v938_v43   ;;  %1559 = vperm.xlu0 %3720, %v937_v42   ;;  %v4438_v43 = vpop.permute.xlu1 %1129  ;;  %v4440_v52 = vpop.permute.xlu0 %1124 }
 0x198   : > { %v649_v2 = vpop.f32.mrf.mxu1 }
 0x199   : > { %v650_v30 = vadd.f32 %v649_v2, %v4177_v34  ;;  %v623_v2 = vadd.f32 %v4257_v0, %v4114_v10  ;;  %v3623_v10 = vld [vmem:[%s5405_s5 + $0x88] sm:$0xff] }
 0x19e   : > { %v4442_v9 = vpop.permute.xlu2 %1134 }
 0x19f   : > { %1579 = vperm.xlu1 %3721, %v941_v21   ;;  %1574 = vperm.xlu0 %3720, %v940_v50   ;;  %v4444_v41 = vpop.permute.xlu1 %1144  ;;  %v4446_v28 = vpop.permute.xlu0 %1139 }
 0x1a0   : > { %v652_v61 = vpop.f32.mrf.mxu1 }
 0x1a1   : > { %v653_v53 = vadd.f32 %v652_v61, %v4191_v39  ;;  %v673_v39 = vmax.f32 %v650_v30, 0.0  ;;  %v635_v30 = vadd.f32 %v4336_v49, %v4131_v17  ;;  %v628_v17 = vadd.f32 %v4291_v19, %v4116_v11 }
 0x1a6   : > { %v4448_v8 = vpop.permute.xlu2 %1149 }
 0x1a7   : > { %v4450_v20 = vpop.permute.xlu1 %1159  ;;  %v4455_v57 = vpop.permute.xlu0 %1154 }
 0x1a8   : > { %v654_v42 = vpop.f32.mrf.mxu1 }
 0x1a9   : > { %v655_v4 = vadd.f32 %v654_v42, %v4208_v45  ;;  %v645_v45 = vadd.f32 %v644_v56, %v4175_v33  ;;  %v664_v42 = vmax.f32 %v628_v17, 0.0 }
 0x1ab   : > { %v675_v26 = vmax.f32 %v655_v4, 0.0 }
 0x1ae   : > { %v4458_v36 = vpop.permute.xlu2 %1164 }
 0x1af   : > { %v4460_v18 = vpop.permute.xlu1 %1174  ;;  %v4467_v34 = vpop.permute.xlu0 %1169 }
 0x1b0   : > { %v657_v59 = vpop.f32.mrf.mxu1 }
 0x1b1   : > { %v658_v21 = vadd.f32 %v657_v59, %v4193_v40  ;;  %v648_v40 = vadd.f32 %v647_v23, %v4186_v37  ;;  %v674_v59 = vmax.f32 %v653_v53, 0.0  ;;  %v640_v37 = vadd.f32 %v4370_v12, %v4164_v29 }
 0x1b2   : > { %v633_v29 = vadd.f32 %v4321_v38, %v4146_v22  ;;  %v625_v23 = vadd.f32 %v4274_v7, %v4127_v15  ;;  %v3606_v7 = vld [vmem:[%s5405_s5] sm:$0xff] }
 0x1b3   : > { %v676_v31 = vmax.f32 %v658_v21, 0.0  ;;  %v672_v61 = vmax.f32 %v648_v40, 0.0  ;;  %v669_v53 = vmax.f32 %v640_v37, 0.0  ;;  %v662_v21 = vmax.f32 %v623_v2, 0.0  ;;  %v3624_v37 = vld [vmem:[%s5405_s5 + $0x90] sm:$0xff]  ;;  %v3626_v2 = vld [vmem:[%s5405_s5 + $0xa0] sm:$0xff] }
 0x1b4   : > { %v666_v49 = vmax.f32 %v633_v29, 0.0  ;;  %v663_v11 = vmax.f32 %v625_v23, 0.0 }
 0x1b6   : > { %v678_v15 = vpack.c.bf16 %v663_v11, %v662_v21  ;;  %v3654_v11 = vld [vmem:[%s5405_s5 + $0x180] sm:$0xff] }
 0x1b7   : > { %v4473_v33 = vpop.permute.xlu1 %1189  ;;  %v4483_v56 = vpop.permute.xlu0 %1184 }
 0x1b8   : > { %v659_v50 = vpop.f32.mrf.mxu1 }
 0x1b9   : > { %v660_v48 = vadd.f32 %v659_v50, %v4210_v46  ;;  %v684_v46 = vpack.c.bf16 %v675_v26, %v674_v59  ;;  %v638_v26 = vadd.f32 %v4353_v60, %v4151_v24  ;;  %v630_v24 = vadd.f32 %v4304_v27, %v4129_v16  ;;  %v3632_v59 = vld [vmem:[%s5405_s5 + $0xd0] sm:$0xff] }
 0x1ba   : > { %v667_v60 = vmax.f32 %v635_v30, 0.0 }
 0x1bb   : > { %v677_v44 = vmax.f32 %v660_v48, 0.0  ;;  %v643_v48 = vadd.f32 %v4383_v32, %v4153_v25  ;;  %v668_v12 = vmax.f32 %v638_v26, 0.0  ;;  %v665_v16 = vmax.f32 %v630_v24, 0.0  ;;  %v3625_v24 = vld [vmem:[%s5405_s5 + $0x98] sm:$0xff] }
 0x1bc   : > { %v680_v27 = vpack.c.bf16 %v667_v60, %v666_v49  ;;  %v3634_v60 = vld [vmem:[%s5405_s5 + $0xe0] sm:$0xff] }
 0x1bd   : > { %v685_v6 = vpack.c.bf16 %v677_v44, %v676_v31  ;;  %v671_v31 = vmax.f32 %v645_v45, 0.0  ;;  %v683_v44 = vpack.c.bf16 %v673_v39, %v672_v61  ;;  %v670_v25 = vmax.f32 %v643_v48, 0.0  ;;  %v3651_v45 = vld [vmem:[%s5405_s5 + $0x168] sm:$0xff] }
 0x1be   : > { %v681_v32 = vpack.c.bf16 %v669_v53, %v668_v12  ;;  %v679_v19 = vpack.c.bf16 %v665_v16, %v664_v42  ;;  %v3607_v61 = vld [vmem:[%s5405_s5 + $0x8] sm:$0xff]  ;;  %v3608_v12 = vld [vmem:[%s5405_s5 + $0x10] sm:$0xff] }
 0x1bf   : > { %1966 = vmatpush.bf16.msrb.mxu0 %v685_v6  ;;  %3671 = vmatpush.bf16.msra.mxu1 %v685_v6  ;;  %v682_v4 = vpack.c.bf16 %v671_v31, %v670_v25  ;;  %v4489_v38 = vpop.permute.xlu1 %1204  ;;  %v4495_v50 = vpop.permute.xlu0 %1199  ;;  %v3633_v31 = vld [vmem:[%s5405_s5 + $0xd8] sm:$0xff]  ;;  %v3635_v42 = vld [vmem:[%s5405_s5 + $0xe8] sm:$0xff] }
 0x1c0   : > { %3672 = vmatpush.bf16.msra.mxu2 %v685_v6  ;;  %3673 = vmatpush.bf16.msra.mxu3 %v685_v6  ;;  %v4471_v6 = vpop.permute.xlu2 %1179  ;;  %5431 = vst [vmem:[#allocation25_spill] sm:$0xff] %v4495_v50 }
 0x1c3   : > { %1967 = vmatpush.bf16.msrb.mxu0 %v684_v46  ;;  %3674 = vmatpush.bf16.msra.mxu1 %v684_v46 }
 0x1c4   : > { %3675 = vmatpush.bf16.msra.mxu2 %v684_v46  ;;  %3676 = vmatpush.bf16.msra.mxu3 %v684_v46 }
 0x1c7   : > { %1968 = vmatpush.bf16.msrb.mxu0 %v683_v44  ;;  %3677 = vmatpush.bf16.msra.mxu1 %v683_v44  ;;  %v4505_v40 = vpop.permute.xlu1 %1219  ;;  %v4513_v39 = vpop.permute.xlu0 %1214 }
 0x1c8   : > { %3678 = vmatpush.bf16.msra.mxu2 %v683_v44  ;;  %3679 = vmatpush.bf16.msra.mxu3 %v683_v44  ;;  %v4487_v22 = vpop.permute.xlu2 %1194  ;;  %v3652_v44 = vld [vmem:[%s5405_s5 + $0x170] sm:$0xff] }
 0x1cb   : > { %1969 = vmatpush.bf16.msrb.mxu0 %v682_v4  ;;  %3680 = vmatpush.bf16.msra.mxu1 %v682_v4 }
 0x1cc   : > { %3681 = vmatpush.bf16.msra.mxu2 %v682_v4  ;;  %3682 = vmatpush.bf16.msra.mxu3 %v682_v4 }
 0x1cf   : > { %1970 = vmatpush.bf16.msrb.mxu0 %v681_v32  ;;  %3683 = vmatpush.bf16.msra.mxu1 %v681_v32  ;;  %v4517_v48 = vpop.permute.xlu1 %1234  ;;  %v4531_v26 = vpop.permute.xlu0 %1229 }
 0x1d0   : > { %3684 = vmatpush.bf16.msra.mxu2 %v681_v32  ;;  %3685 = vmatpush.bf16.msra.mxu3 %v681_v32  ;;  %v4503_v0 = vpop.permute.xlu2 %1209  ;;  %v3653_v32 = vld [vmem:[%s5405_s5 + $0x178] sm:$0xff] }
 0x1d3   : > { %1971 = vmatpush.bf16.msrb.mxu0 %v680_v27  ;;  %3686 = vmatpush.bf16.msra.mxu1 %v680_v27 }
 0x1d4   : > { %3687 = vmatpush.bf16.msra.mxu2 %v680_v27  ;;  %3688 = vmatpush.bf16.msra.mxu3 %v680_v27  ;;  %v3609_v27 = vld [vmem:[%s5405_s5 + $0x18] sm:$0xff] }
 0x1d7   : > { %1972 = vmatpush.bf16.msrb.mxu0 %v679_v19  ;;  %3689 = vmatpush.bf16.msra.mxu1 %v679_v19  ;;  %v4535_v30 = vpop.permute.xlu1 %1249  ;;  %v4537_v53 = vpop.permute.xlu0 %1244 }
 0x1d8   : > { %3690 = vmatpush.bf16.msra.mxu2 %v679_v19  ;;  %3691 = vmatpush.bf16.msra.mxu3 %v679_v19  ;;  %v4515_v46 = vpop.permute.xlu2 %1224 }
 0x1db   : > { %1973 = vmatpush.bf16.msrb.mxu0 %v678_v15  ;;  %3692 = vmatpush.bf16.msra.mxu1 %v678_v15 }
 0x1dc   : > { %3693 = vmatpush.bf16.msra.mxu2 %v678_v15  ;;  %3694 = vmatpush.bf16.msra.mxu3 %v678_v15 }
 0x1de   : > { %1974 = vmatmul.bf16.vlgmr.msrb.gmra.mxu0 %v3606_v7  ;;  %2059 = vmatmul.bf16.vlgmr.msra.gmra.mxu1 %v3623_v10 }
 0x1df   : > { %2104 = vmatmul.bf16.vlgmr.msra.gmra.mxu2 %v3632_v59  ;;  %2199 = vmatmul.bf16.vlgmr.msra.gmra.mxu3 %v3651_v45  ;;  %v4541_v29 = vpop.permute.xlu1 %1264  ;;  %v4555_v17 = vpop.permute.xlu0 %1259  ;;  %v3610_v59 = vld [vmem:[%s5405_s5 + $0x20] sm:$0xff]  ;;  %v3627_v45 = vld [vmem:[%s5405_s5 + $0xa8] sm:$0xff] }
 0x1e0   : > { %v4533_v25 = vpop.permute.xlu2 %1239 }
 0x1e7   : > { %v4559_v23 = vpop.permute.xlu1 %1279  ;;  %v4561_v16 = vpop.permute.xlu0 %1274 }
 0x1e8   : > { %v4539_v4 = vpop.permute.xlu2 %1254  ;;  %5432 = vst [vmem:[#allocation26_spill] sm:$0xff] %v4559_v23 }
 0x1ee   : > { %1979 = vmatmul.bf16.gmra.mxu0 %v3607_v61  ;;  %2064 = vmatmul.bf16.gmra.mxu1 %v3624_v37  ;;  %v3636_v61 = vld [vmem:[%s5405_s5 + $0xf0] sm:$0xff]  ;;  %v3655_v37 = vld [vmem:[%s5405_s5 + $0x188] sm:$0xff] }
 0x1ef   : > { %2109 = vmatmul.bf16.gmra.mxu2 %v3633_v31  ;;  %2204 = vmatmul.bf16.gmra.mxu3 %v3652_v44  ;;  %v4577_v21 = vpop.permute.xlu1 %1294  ;;  %v4579_v15 = vpop.permute.xlu0 %1289 }
 0x1f0   : > { %v4557_v49 = vpop.permute.xlu2 %1269  ;;  %5434 = vst [vmem:[#allocation28_spill] sm:$0xff] %v4577_v21 }
 0x1f1   : > { %5435 = vst [vmem:[#allocation29_spill] sm:$0xff] %v4579_v15 }
 0x1f7   : > { %v4583_v10 = vpop.permute.xlu1 %1309  ;;  %v4597_v31 = vpop.permute.xlu0 %1304 }
 0x1f8   : > { %v4575_v19 = vpop.permute.xlu2 %1284  ;;  %5437 = vst [vmem:[#allocation31_spill] sm:$0xff] %v4583_v10 }
 0x1f9   : > { %5433 = vst [vmem:[#allocation27_spill] sm:$0xff] %v4575_v19 }
 0x1fa   : > { %5438 = vst [vmem:[#allocation32_spill] sm:$0xff] %v4597_v31 }
 0x1fe   : > { %1984 = vmatmul.bf16.gmra.mxu0 %v3608_v12  ;;  %2069 = vmatmul.bf16.gmra.mxu1 %v3625_v24 }
 0x1ff   : > { %2114 = vmatmul.bf16.gmra.mxu2 %v3634_v60  ;;  %2209 = vmatmul.bf16.gmra.mxu3 %v3653_v32  ;;  %v4601_v12 = vpop.permute.xlu1 %1324  ;;  %v4603_v24 = vpop.permute.xlu0 %1319  ;;  %v3611_v60 = vld [vmem:[%s5405_s5 + $0x28] sm:$0xff]  ;;  %v3628_v32 = vld [vmem:[%s5405_s5 + $0xb0] sm:$0xff] }
 0x200   : > { %v4581_v7 = vpop.permute.xlu2 %1299  ;;  %5440 = vst [vmem:[#allocation34_spill] sm:$0xff] %v4601_v12 }
 0x201   : > { %5436 = vst [vmem:[#allocation30_spill] sm:$0xff] %v4581_v7 }
 0x202   : > { %5441 = vst [vmem:[#allocation35_spill] sm:$0xff] %v4603_v24 }
 0x208   : > { %v4599_v44 = vpop.permute.xlu2 %1314 }
 0x209   : > { %5439 = vst [vmem:[#allocation33_spill] sm:$0xff] %v4599_v44 }
 0x20e   : > { %1989 = vmatmul.bf16.gmra.mxu0 %v3609_v27  ;;  %2074 = vmatmul.bf16.gmra.mxu1 %v3626_v2  ;;  %v4613_v2 = vpop.permute.xlu1 %1339 }
 0x20f   : > { %2119 = vmatmul.bf16.gmra.mxu2 %v3635_v42  ;;  %2214 = vmatmul.bf16.gmra.mxu3 %v3654_v11  ;;  %5443 = vst [vmem:[#allocation37_spill] sm:$0xff] %v4613_v2  ;;  %v3637_v42 = vld [vmem:[%s5405_s5 + $0xf8] sm:$0xff]  ;;  %v3656_v11 = vld [vmem:[%s5405_s5 + $0x190] sm:$0xff] }
 0x210   : > { %v4611_v27 = vpop.permute.xlu2 %1329  ;;  %v3629_v2 = vld [vmem:[%s5405_s5 + $0xb8] sm:$0xff] }
 0x211   : > { %5442 = vst [vmem:[#allocation36_spill] sm:$0xff] %v4611_v27  ;;  %v3613_v27 = vld [vmem:[%s5405_s5 + $0x38] sm:$0xff] }
 0x21e   : > { %1994 = vmatmul.bf16.gmra.mxu0 %v3610_v59  ;;  %2079 = vmatmul.bf16.gmra.mxu1 %v3627_v45  ;;  %v4621_v59 = vpop.permute.xlu0 %1334  ;;  %v4623_v45 = vpop.permute.xlu2 %1344 }
 0x21f   : > { %2124 = vmatmul.bf16.gmra.mxu2 %v3636_v61  ;;  %2219 = vmatmul.bf16.gmra.mxu3 %v3655_v37  ;;  %5444 = vst [vmem:[#allocation38_spill] sm:$0xff] %v4621_v59  ;;  %v4625_v61 = vpop.permute.xlu1 %1354  ;;  %v3612_v37 = vld [vmem:[%s5405_s5 + $0x30] sm:$0xff] }
 0x220   : > { %5445 = vst [vmem:[#allocation39_spill] sm:$0xff] %v4623_v45 }
 0x221   : > { %5446 = vst [vmem:[#allocation40_spill] sm:$0xff] %v4625_v61 }
 0x227   : > { %v4643_v61 = vpop.permute.xlu1 %1369 }
 0x228   : > { %5449 = vst [vmem:[#allocation43_spill] sm:$0xff] %v4643_v61 }
 0x22e   : > { %1999 = vmatmul.bf16.gmra.mxu0 %v3611_v60  ;;  %2084 = vmatmul.bf16.gmra.mxu1 %v3628_v32  ;;  %v3638_v60 = vld [vmem:[%s5405_s5 + $0x100] sm:$0xff]  ;;  %v3657_v32 = vld [vmem:[%s5405_s5 + $0x198] sm:$0xff] }
 0x22f   : > { %2129 = vmatmul.bf16.gmra.mxu2 %v3637_v42  ;;  %2224 = vmatmul.bf16.gmra.mxu3 %v3656_v11  ;;  %v4639_v42 = vpop.permute.xlu0 %1349  ;;  %v4641_v11 = vpop.permute.xlu2 %1359 }
 0x230   : > { %5447 = vst [vmem:[#allocation41_spill] sm:$0xff] %v4639_v42  ;;  %v4649_v12 = vpop.permute.xlu1 %1384 }
 0x231   : > { %5448 = vst [vmem:[#allocation42_spill] sm:$0xff] %v4641_v11  ;;  %v3631_v11 = vld [vmem:[%s5405_s5 + $0xc8] sm:$0xff] }
 0x232   : > { %5452 = vst [vmem:[#allocation46_spill] sm:$0xff] %v4649_v12 }
 0x237   : > { %v4645_v45 = vpop.permute.xlu0 %1364  ;;  %v4647_v59 = vpop.permute.xlu2 %1374 }
 0x238   : > { %5450 = vst [vmem:[#allocation44_spill] sm:$0xff] %v4645_v45  ;;  %v1400_v61 = vpop.permute.xlu1 %1399  ;;  %v3614_v45 = vld [vmem:[%s5405_s5 + $0x40] sm:$0xff] }
 0x239   : > { %5451 = vst [vmem:[#allocation45_spill] sm:$0xff] %v4647_v59 }
 0x23e   : > { %2004 = vmatmul.bf16.gmra.mxu0 %v3612_v37  ;;  %2089 = vmatmul.bf16.gmra.mxu1 %v3629_v2  ;;  %v3630_v2 = vld [vmem:[%s5405_s5 + $0xc0] sm:$0xff]  ;;  %v3639_v37 = vld [vmem:[%s5405_s5 + $0x108] sm:$0xff] }
 0x23f   : > { %2134 = vmatmul.bf16.gmra.mxu2 %v3638_v60  ;;  %2229 = vmatmul.bf16.gmra.mxu3 %v3657_v32  ;;  %v3658_v60 = vld [vmem:[%s5405_s5 + $0x1a0] sm:$0xff]  ;;  %v4663_v32 = vpop.permute.xlu0 %1379  ;;  %v4665_v12 = vpop.permute.xlu2 %1389 }
 0x240   : > { %5453 = vst [vmem:[#allocation47_spill] sm:$0xff] %v4663_v32 }
 0x241   : > { %5454 = vst [vmem:[#allocation48_spill] sm:$0xff] %v4665_v12  ;;  %v4680_v12 = vpop.permute.xlu1 %1414 }
 0x247   : > { %v1395_v59 = vpop.permute.xlu0 %1394 }
 0x24e   : > { %2009 = vmatmul.bf16.gmra.mxu0 %v3613_v27  ;;  %2094 = vmatmul.bf16.gmra.mxu1 %v3630_v2  ;;  %v3640_v27 = vld [vmem:[%s5405_s5 + $0x110] sm:$0xff]  ;;  %v3659_v2 = vld [vmem:[%s5405_s5 + $0x1a8] sm:$0xff] }
 0x24f   : > { %2139 = vmatmul.bf16.gmra.mxu2 %v3639_v37  ;;  %2234 = vmatmul.bf16.gmra.mxu3 %v3658_v60  ;;  %v1405_v60 = vpop.permute.xlu2 %1404  ;;  %v4684_v50 = vpop.permute.xlu0 %1409 }
 0x25b   : > { %v1975_v42 = vpop.f32.mrf.mxu0  ;;  %v2060_v24 = vpop.f32.mrf.mxu1 }
 0x25c   : > { %v1976_v37 = vadd.f32 %v1975_v42, %v4223_v51  ;;  %v2061_v10 = vadd.f32 %v2060_v24, %v4426_v1 }
 0x25e   : > { %v2295_v32 = vmax.f32 %v1976_v37, 0.0  ;;  %2014 = vmatmul.bf16.gmra.mxu0 %v3614_v45  ;;  %2099 = vmatmul.bf16.gmra.mxu1 %v3631_v11  ;;  %v2329_v42 = vmax.f32 %v2061_v10, 0.0  ;;  %v4686_v37 = vpop.permute.xlu2 %1419  ;;  %v4688_v45 = vpop.permute.xlu1 %1429 }
 0x25f   : > { %2144 = vmatmul.bf16.gmra.mxu2 %v3640_v27  ;;  %2239 = vmatmul.bf16.gmra.mxu3 %v3659_v2  ;;  %v4702_v11 = vpop.permute.xlu0 %1424 }
 0x260   : > { %2423 = vmax.xlane.f32.xlu2 %v2295_v32 }
 0x262   : > { %v2105_v44 = vpop.f32.mrf.mxu2  ;;  %v2200_v31 = vpop.f32.mrf.mxu3 }
 0x263   : > { %v2201_v21 = vadd.f32 %v2200_v31, %v1395_v59  ;;  %v1977_v7 = vpop.f32.mrf.mxu0  ;;  %v2062_v15 = vpop.f32.mrf.mxu1 }
 0x264   : > { %v1978_v23 = vadd.f32 %v1977_v7, %v4212_v47  ;;  %v2063_v1 = vadd.f32 %v2062_v15, %v4436_v35  ;;  %v3615_v47 = vld [vmem:[%s5405_s5 + $0x48] sm:$0xff]  ;;  %v2106_v7 = vadd.f32 %v2105_v44, %v4489_v38 }
 0x265   : > { %v2385_v51 = vmax.f32 %v2201_v21, 0.0 }
 0x266   : > { %v2296_v19 = vmax.f32 %v1978_v23, 0.0  ;;  %v3641_v23 = vld [vmem:[%s5405_s5 + $0x118] sm:$0xff]  ;;  %v2330_v15 = vmax.f32 %v2063_v1, 0.0  ;;  %v2347_v32 = vmax.f32 %v2106_v7, 0.0  ;;  %v4704_v38 = vpop.permute.xlu2 %1434  ;;  %v4706_v44 = vpop.permute.xlu1 %1444 }
 0x267   : > { %2603 = vmax.xlane.f32.xlu1 %v2385_v51 }
 0x268   : > { %2425 = vmax.xlane.f32.xlu0 %v2296_v19  ;;  %2491 = vmax.xlane.f32.xlu2 %v2329_v42  ;;  %v3660_v19 = vld [vmem:[%s5405_s5 + $0x1b0] sm:$0xff] }
 0x26a   : > { %v2107_v24 = vpop.f32.mrf.mxu2  ;;  %v2202_v31 = vpop.f32.mrf.mxu3 }
 0x26b   : > { %v1980_v21 = vpop.f32.mrf.mxu0  ;;  %v2065_v10 = vpop.f32.mrf.mxu1  ;;  %v2108_v27 = vadd.f32 %v2107_v24, %v4503_v0  ;;  %v2203_v42 = vadd.f32 %v2202_v31, %v1400_v61 }
 0x26c   : > { %v1981_v35 = vadd.f32 %v1980_v21, %v4231_v54  ;;  %v2066_v2 = vadd.f32 %v2065_v10, %v4440_v52  ;;  %v3616_v52 = vld [vmem:[%s5405_s5 + $0x50] sm:$0xff]  ;;  %v3642_v10 = vld [vmem:[%s5405_s5 + $0x120] sm:$0xff] }
 0x26d   : > { %v2348_v21 = vmax.f32 %v2108_v27, 0.0 }
 0x26e   : > { %v2297_v59 = vmax.f32 %v1981_v35, 0.0  ;;  %2019 = vmatmul.bf16.gmra.mxu0 %v3615_v47  ;;  %v2331_v7 = vmax.f32 %v2066_v2, 0.0  ;;  %v4716_v61 = vpop.permute.xlu2 %1449 }
 0x26f   : > { %2149 = vmatmul.bf16.gmra.mxu2 %v3641_v23  ;;  %2244 = vmatmul.bf16.gmra.mxu3 %v3660_v19  ;;  %v2386_v23 = vmax.f32 %v2203_v42, 0.0  ;;  %v4710_v19 = vpop.permute.xlu0 %1439 }
 0x270   : > { %2427 = vmax.xlane.f32.xlu1 %v2297_v59  ;;  %2493 = vmax.xlane.f32.xlu0 %v2330_v15 }
 0x271   : > { %2527 = vmax.xlane.f32.xlu2 %v2347_v32 }
 0x272   : > { %v2110_v54 = vpop.f32.mrf.mxu2  ;;  %v2205_v51 = vpop.f32.mrf.mxu3 }
 0x273   : > { %v1982_v1 = vpop.f32.mrf.mxu0  ;;  %v2067_v47 = vpop.f32.mrf.mxu1  ;;  %v2111_v35 = vadd.f32 %v2110_v54, %v4513_v39  ;;  %v2206_v15 = vadd.f32 %v2205_v51, %v1405_v60  ;;  %v3661_v39 = vld [vmem:[%s5405_s5 + $0x1b8] sm:$0xff] }
 0x274   : > { %v1983_v24 = vadd.f32 %v1982_v1, %v4242_v58  ;;  %v4725_v60 = vpop.permute.xlu1 %1459 }
 0x275   : > { %v2349_v27 = vmax.f32 %v2111_v35, 0.0  ;;  %v2387_v2 = vmax.f32 %v2206_v15, 0.0 }
 0x276   : > { %v2298_v54 = vmax.f32 %v1983_v24, 0.0  ;;  %v4732_v35 = vpop.permute.xlu2 %1464 }
 0x278   : > { %2495 = vmax.xlane.f32.xlu1 %v2331_v7  ;;  %2529 = vmax.xlane.f32.xlu0 %v2348_v21  ;;  %v4729_v21 = vpop.permute.xlu0 %1454  ;;  %v2068_v7 = vadd.f32 %v2067_v47, %v4438_v43  ;;  %v3617_v43 = vld [vmem:[%s5405_s5 + $0x58] sm:$0xff] }
 0x279   : > { %2605 = vmax.xlane.f32.xlu2 %v2386_v23 }
 0x27a   : > { %v2112_v59 = vpop.f32.mrf.mxu2  ;;  %v2207_v0 = vpop.f32.mrf.mxu3 }
 0x27b   : > { %v1985_v31 = vpop.f32.mrf.mxu0  ;;  %v2070_v32 = vpop.f32.mrf.mxu1  ;;  %v2208_v58 = vadd.f32 %v2207_v0, %v4684_v50  ;;  %v2113_v47 = vadd.f32 %v2112_v59, %v4505_v40 }
 0x27c   : > { %v2071_v51 = vadd.f32 %v2070_v32, %v4442_v9  ;;  %v4734_v24 = vpop.permute.xlu1 %1474 }
 0x27d   : > { %v2388_v15 = vmax.f32 %v2208_v58, 0.0 }
 0x27e   : > { %2024 = vmatmul.bf16.gmra.mxu0 %v3616_v52  ;;  %v2333_v52 = vmax.f32 %v2071_v51, 0.0  ;;  %v4750_v51 = vpop.permute.xlu2 %1479 }
 0x27f   : > { %2154 = vmatmul.bf16.gmra.mxu2 %v3642_v10  ;;  %2249 = vmatmul.bf16.gmra.mxu3 %v3661_v39  ;;  %v2332_v10 = vmax.f32 %v2068_v7, 0.0 }
 0x280   : > { %2531 = vmax.xlane.f32.xlu1 %v2349_v27  ;;  %2607 = vmax.xlane.f32.xlu0 %v2387_v2  ;;  %v3643_v2 = vld [vmem:[%s5405_s5 + $0x128] sm:$0xff] }
 0x281   : > { %2429 = vmax.xlane.f32.xlu2 %v2298_v54  ;;  %v3662_v54 = vld [vmem:[%s5405_s5 + $0x1c0] sm:$0xff] }
 0x282   : > { %v2115_v42 = vpop.f32.mrf.mxu2  ;;  %v2210_v1 = vpop.f32.mrf.mxu3 }
 0x283   : > { %v1987_v23 = vpop.f32.mrf.mxu0  ;;  %v2072_v39 = vpop.f32.mrf.mxu1  ;;  %v2116_v9 = vadd.f32 %v2115_v42, %v4515_v46  ;;  %v2350_v42 = vmax.f32 %v2113_v47, 0.0 }
 0x284   : > { %v2073_v50 = vadd.f32 %v2072_v39, %v4446_v28  ;;  %v4748_v46 = vpop.permute.xlu0 %1469  ;;  %v4752_v40 = vpop.permute.xlu1 %1489  ;;  %v1988_v59 = vadd.f32 %v1987_v23, %v4253_v62 }
 0x285   : > { %v2351_v28 = vmax.f32 %v2116_v9, 0.0 }
 0x286   : > { %v2334_v58 = vmax.f32 %v2073_v50, 0.0  ;;  %v2300_v50 = vmax.f32 %v1988_v59, 0.0 }
 0x288   : > { %2609 = vmax.xlane.f32.xlu1 %v2388_v15  ;;  %2499 = vmax.xlane.f32.xlu0 %v2333_v52 }
 0x289   : > { %2497 = vmax.xlane.f32.xlu2 %v2332_v10  ;;  %v1986_v10 = vadd.f32 %v1985_v31, %v4233_v55  ;;  %v3618_v55 = vld [vmem:[%s5405_s5 + $0x60] sm:$0xff]  ;;  %v2211_v31 = vadd.f32 %v2210_v1, %v4680_v12 }
 0x28a   : > { %v2117_v0 = vpop.f32.mrf.mxu2  ;;  %v2212_v32 = vpop.f32.mrf.mxu3 }
 0x28b   : > { %v1990_v27 = vpop.f32.mrf.mxu0  ;;  %v2118_v7 = vadd.f32 %v2117_v0, %v4531_v26  ;;  %v2075_v39 = vpop.f32.mrf.mxu1  ;;  %v2213_v62 = vadd.f32 %v2212_v32, %v4686_v37  ;;  %v3663_v37 = vld [vmem:[%s5405_s5 + $0x1c8] sm:$0xff]  ;;  %v2389_v59 = vmax.f32 %v2211_v31, 0.0 }
 0x28c   : > { %v4759_v47 = vpop.permute.xlu0 %1484  ;;  %v1991_v26 = vadd.f32 %v1990_v27, %v4265_v3  ;;  %v4777_v32 = vpop.permute.xlu1 %1504 }
 0x28d   : > { %v2390_v27 = vmax.f32 %v2213_v62, 0.0 }
 0x28e   : > { %2029 = vmatmul.bf16.gmra.mxu0 %v3617_v43  ;;  %v2352_v43 = vmax.f32 %v2118_v7, 0.0 }
 0x28f   : > { %2159 = vmatmul.bf16.gmra.mxu2 %v3643_v2  ;;  %2254 = vmatmul.bf16.gmra.mxu3 %v3662_v54  ;;  %v2299_v2 = vmax.f32 %v1986_v10, 0.0  ;;  %v4761_v54 = vpop.permute.xlu2 %1494 }
 0x290   : > { %2501 = vmax.xlane.f32.xlu1 %v2334_v58  ;;  %2535 = vmax.xlane.f32.xlu0 %v2351_v28  ;;  %v3644_v58 = vld [vmem:[%s5405_s5 + $0x130] sm:$0xff] }
 0x291   : > { %2533 = vmax.xlane.f32.xlu2 %v2350_v42  ;;  %v2301_v42 = vmax.f32 %v1991_v26, 0.0 }
 0x292   : > { %v2120_v15 = vpop.f32.mrf.mxu2  ;;  %v2215_v52 = vpop.f32.mrf.mxu3 }
 0x293   : > { %v4757_v9 = vpop.f32.mrf.mxu0  ;;  %v2077_v3 = vpop.f32.mrf.mxu1  ;;  %v2216_v1 = vadd.f32 %v2215_v52, %v4702_v11 }
 0x294   : > { %v4779_v12 = vpop.permute.xlu0 %1499  ;;  %v2078_v7 = vadd.f32 %v2077_v3, %v4448_v8  ;;  %v4786_v31 = vpop.permute.xlu1 %1519 }
 0x295   : > { %v2391_v26 = vmax.f32 %v2216_v1, 0.0 }
 0x298   : > { %2537 = vmax.xlane.f32.xlu1 %v2352_v43  ;;  %2433 = vmax.xlane.f32.xlu0 %v2300_v50  ;;  %v4783_v43 = vpop.permute.xlu2 %1509 }
 0x299   : > { %2431 = vmax.xlane.f32.xlu2 %v2299_v2  ;;  %v2076_v2 = vadd.f32 %v2075_v39, %v4444_v41  ;;  %v3619_v41 = vld [vmem:[%s5405_s5 + $0x68] sm:$0xff] }
 0x29a   : > { %v2122_v23 = vpop.f32.mrf.mxu2  ;;  %v4765_v0 = vpop.f32.mrf.mxu3 }
 0x29b   : > { %v1995_v28 = vpop.f32.mrf.mxu0  ;;  %v2123_v11 = vadd.f32 %v2122_v23, %v4533_v25 }
 0x29c   : > { %v4795_v39 = vpop.permute.xlu0 %1514 }
 0x29d   : > { %v2354_v23 = vmax.f32 %v2123_v11, 0.0 }
 0x29e   : > { %2034 = vmatmul.bf16.gmra.mxu0 %v3618_v55  ;;  %v2336_v55 = vmax.f32 %v2078_v7, 0.0 }
 0x29f   : > { %2164 = vmatmul.bf16.gmra.mxu2 %v3644_v58  ;;  %2259 = vmatmul.bf16.gmra.mxu3 %v3663_v37  ;;  %v2335_v58 = vmax.f32 %v2076_v2, 0.0  ;;  %v2080_v37 = vpop.f32.mrf.mxu1 }
 0x2a0   : > { %2435 = vmax.xlane.f32.xlu1 %v2301_v42  ;;  %2613 = vmax.xlane.f32.xlu0 %v2390_v27  ;;  %v2081_v8 = vadd.f32 %v2080_v37, %v4455_v57  ;;  %v2121_v27 = vadd.f32 %v2120_v15, %v4517_v48  ;;  %v3664_v57 = vld [vmem:[%s5405_s5 + $0x1d0] sm:$0xff]  ;;  %v4806_v25 = vpop.permute.xlu2 %1524  ;;  %v4808_v48 = vpop.permute.xlu1 %1534  ;;  %v1996_v15 = vadd.f32 %v1995_v28, %v4270_v5 }
 0x2a1   : > { %2611 = vmax.xlane.f32.xlu2 %v2389_v59  ;;  %v3645_v59 = vld [vmem:[%s5405_s5 + $0x138] sm:$0xff] }
 0x2a2   : > { %v2125_v10 = vpop.f32.mrf.mxu2  ;;  %v2220_v50 = vpop.f32.mrf.mxu3  ;;  %v2337_v1 = vmax.f32 %v2081_v8, 0.0  ;;  %v2353_v7 = vmax.f32 %v2121_v27, 0.0 }
 0x2a3   : > { %v1997_v62 = vpop.f32.mrf.mxu0  ;;  %v2126_v2 = vadd.f32 %v2125_v10, %v4537_v53  ;;  %v2221_v5 = vadd.f32 %v2220_v50, %v4704_v38 }
 0x2a4   : > { %v4818_v8 = vpop.permute.xlu0 %1529  ;;  %v1998_v53 = vadd.f32 %v1997_v62, %v4285_v13  ;;  %v3665_v13 = vld [vmem:[%s5405_s5 + $0x1d8] sm:$0xff] }
 0x2a5   : > { %v2355_v27 = vmax.f32 %v2126_v2, 0.0  ;;  %v2393_v62 = vmax.f32 %v2221_v5, 0.0 }
 0x2a7   : > { %v2082_v37 = vpop.f32.mrf.mxu1 }
 0x2a8   : > { %2615 = vmax.xlane.f32.xlu1 %v2391_v26  ;;  %2505 = vmax.xlane.f32.xlu0 %v2336_v55  ;;  %v4839_v38 = vpop.permute.xlu1 %1549 }
 0x2a9   : > { %2503 = vmax.xlane.f32.xlu2 %v2335_v58  ;;  %v1993_v58 = vadd.f32 %v4757_v9, %v4255_v63  ;;  %v3620_v63 = vld [vmem:[%s5405_s5 + $0x70] sm:$0xff]  ;;  %v2218_v9 = vadd.f32 %v4765_v0, %v4688_v45 }
 0x2aa   : > { %v4790_v52 = vpop.f32.mrf.mxu2  ;;  %v2222_v3 = vpop.f32.mrf.mxu3 }
 0x2ab   : > { %v4798_v42 = vpop.f32.mrf.mxu0  ;;  %v2392_v2 = vmax.f32 %v2218_v9, 0.0  ;;  %v2223_v0 = vadd.f32 %v2222_v3, %v4710_v19 }
 0x2ae   : > { %2039 = vmatmul.bf16.gmra.mxu0 %v3619_v41  ;;  %v2303_v41 = vmax.f32 %v1996_v15, 0.0  ;;  %v4841_v15 = vpop.permute.xlu0 %1544 }
 0x2af   : > { %2169 = vmatmul.bf16.gmra.mxu2 %v3645_v59  ;;  %2264 = vmatmul.bf16.gmra.mxu3 %v3664_v57  ;;  %v4820_v59 = vpop.permute.xlu2 %1539  ;;  %v2302_v57 = vmax.f32 %v1993_v58, 0.0  ;;  %v2085_v50 = vpop.f32.mrf.mxu1 }
 0x2b0   : > { %2507 = vmax.xlane.f32.xlu1 %v2337_v1  ;;  %2541 = vmax.xlane.f32.xlu0 %v2354_v23  ;;  %v3646_v1 = vld [vmem:[%s5405_s5 + $0x140] sm:$0xff]  ;;  %v2086_v58 = vadd.f32 %v2085_v50, %v4458_v36  ;;  %v4854_v9 = vpop.permute.xlu1 %1564 }
 0x2b1   : > { %2539 = vmax.xlane.f32.xlu2 %v2353_v7  ;;  %v2304_v7 = vmax.f32 %v1998_v53, 0.0  ;;  %v2394_v53 = vmax.f32 %v2223_v0, 0.0 }
 0x2b2   : > { %v2130_v26 = vpop.f32.mrf.mxu2  ;;  %v4812_v55 = vpop.f32.mrf.mxu3 }
 0x2b3   : > { %v4816_v11 = vpop.f32.mrf.mxu0  ;;  %v2131_v36 = vadd.f32 %v2130_v26, %v4539_v4  ;;  %v3666_v4 = vld [vmem:[%s5405_s5 + $0x1e0] sm:$0xff] }
 0x2b5   : > { %v2357_v26 = vmax.f32 %v2131_v36, 0.0 }
 0x2b6   : > { %v4856_v19 = vpop.permute.xlu0 %1559 }
 0x2b7   : > { %v4843_v45 = vpop.permute.xlu2 %1554 }
 0x2b8   : > { %2543 = vmax.xlane.f32.xlu1 %v2355_v27  ;;  %2439 = vmax.xlane.f32.xlu0 %v2303_v41 }
 0x2b9   : > { %2437 = vmax.xlane.f32.xlu2 %v2302_v57  ;;  %v2083_v57 = vadd.f32 %v2082_v37, %v4450_v20  ;;  %v3621_v37 = vld [vmem:[%s5405_s5 + $0x78] sm:$0xff] }
 0x2ba   : > { %v2132_v28 = vpop.f32.mrf.mxu2  ;;  %v4824_v10 = vpop.f32.mrf.mxu3 }
 0x2bb   : > { %v4831_v23 = vpop.f32.mrf.mxu0 }
 0x2be   : > { %2044 = vmatmul.bf16.gmra.mxu0 %v3620_v63  ;;  %v2339_v63 = vmax.f32 %v2086_v58, 0.0 }
 0x2bf   : > { %2174 = vmatmul.bf16.gmra.mxu2 %v3646_v1  ;;  %2269 = vmatmul.bf16.gmra.mxu3 %v3665_v13  ;;  %v2338_v1 = vmax.f32 %v2083_v57, 0.0  ;;  %v2087_v13 = vpop.f32.mrf.mxu1  ;;  %v2133_v57 = vadd.f32 %v2132_v28, %v4555_v17 }
 0x2c0   : > { %2441 = vmax.xlane.f32.xlu1 %v2304_v7  ;;  %2619 = vmax.xlane.f32.xlu0 %v2393_v62  ;;  %v2088_v3 = vadd.f32 %v2087_v13, %v4467_v34  ;;  %v2128_v62 = vadd.f32 %v4790_v52, %v4535_v30  ;;  %v3647_v7 = vld [vmem:[%s5405_s5 + $0x148] sm:$0xff]  ;;  %v4875_v34 = vpop.permute.xlu2 %1569  ;;  %v4880_v30 = vpop.permute.xlu1 %1579  ;;  %v2003_v52 = vadd.f32 %v4816_v11, %v4287_v14 }
 0x2c1   : > { %2617 = vmax.xlane.f32.xlu2 %v2392_v2  ;;  %v2228_v11 = vadd.f32 %v4824_v10, %v4716_v61  ;;  %v3648_v61 = vld [vmem:[%s5405_s5 + $0x150] sm:$0xff]  ;;  %v3667_v10 = vld [vmem:[%s5405_s5 + $0x1e8] sm:$0xff] }
 0x2c2   : > { %v4847_v41 = vpop.f32.mrf.mxu2  ;;  %v4849_v27 = vpop.f32.mrf.mxu3  ;;  %v2340_v2 = vmax.f32 %v2088_v3, 0.0  ;;  %v2356_v0 = vmax.f32 %v2128_v62, 0.0  ;;  %v2306_v62 = vmax.f32 %v2003_v52, 0.0 }
 0x2c3   : > { %v4852_v5 = vpop.f32.mrf.mxu0  ;;  %v4896_v3 = vpop.permute.xlu0 %1574 }
 0x2c7   : > { %v2090_v36 = vpop.f32.mrf.mxu1 }
 0x2c8   : > { %2621 = vmax.xlane.f32.xlu1 %v2394_v53  ;;  %2511 = vmax.xlane.f32.xlu0 %v2339_v63 }
 0x2c9   : > { %2509 = vmax.xlane.f32.xlu2 %v2338_v1  ;;  %v5455_v1 = vld [vmem:[#allocation2_spill] sm:$0xff] }
 0x2ca   : > { %v4860_v50 = vpop.f32.mrf.mxu2  ;;  %v4862_v20 = vpop.f32.mrf.mxu3  ;;  %v2001_v13 = vadd.f32 %v4798_v42, %v5455_v1  ;;  %v5456_v42 = vld [vmem:[#allocation4_spill] sm:$0xff] }
 0x2cb   : > { %v4878_v58 = vpop.f32.mrf.mxu0  ;;  %v2006_v28 = vadd.f32 %v4831_v23, %v5456_v42 }
 0x2cc   : > { %v2305_v14 = vmax.f32 %v2001_v13, 0.0  ;;  %v2396_v13 = vmax.f32 %v2228_v11, 0.0 }
 0x2ce   : > { %2049 = vmatmul.bf16.gmra.mxu0 %v3621_v37 }
 0x2cf   : > { %2179 = vmatmul.bf16.gmra.mxu2 %v3647_v7  ;;  %2274 = vmatmul.bf16.gmra.mxu3 %v3666_v4  ;;  %v2358_v7 = vmax.f32 %v2133_v57, 0.0  ;;  %v2092_v57 = vpop.f32.mrf.mxu1 }
 0x2d0   : > { %2513 = vmax.xlane.f32.xlu1 %v2340_v2  ;;  %2547 = vmax.xlane.f32.xlu0 %v2357_v26  ;;  %v3622_v2 = vld [vmem:[%s5405_s5 + $0x80] sm:$0xff] }
 0x2d1   : > { %2545 = vmax.xlane.f32.xlu2 %v2356_v0  ;;  %v2226_v0 = vadd.f32 %v4812_v55, %v4706_v44  ;;  %v2231_v55 = vadd.f32 %v4849_v27, %v4729_v21 }
 0x2d2   : > { %v4890_v53 = vpop.f32.mrf.mxu2  ;;  %v4892_v63 = vpop.f32.mrf.mxu3 }
 0x2d3   : > { %v2424_v37 = vpop.xlane.xlu2 %2423  ;;  %v4900_v17 = vpop.f32.mrf.mxu0  ;;  %v2395_v44 = vmax.f32 %v2226_v0, 0.0  ;;  %v2397_v0 = vmax.f32 %v2231_v55, 0.0  ;;  %v5457_v55 = vld [vmem:[#allocation5_spill] sm:$0xff] }
 0x2d4   : > { %2684 = vst.msk [vmem:[%s4885_s17] sm:$0xff] %vm2683_vm3, %v2424_v37  ;;  %v2307_v37 = vmax.f32 %v2006_v28, 0.0 }
 0x2d8   : > { %2549 = vmax.xlane.f32.xlu1 %v2358_v7  ;;  %2445 = vmax.xlane.f32.xlu0 %v2306_v62  ;;  %v2093_v62 = vadd.f32 %v2092_v57, %v4471_v6  ;;  %v2095_v6 = vpop.f32.mrf.mxu1  ;;  %v3649_v57 = vld [vmem:[%s5405_s5 + $0x158] sm:$0xff] }
 0x2d9   : > { %2443 = vmax.xlane.f32.xlu2 %v2305_v14  ;;  %v2091_v14 = vadd.f32 %v2090_v36, %v4460_v18  ;;  %v2138_v18 = vadd.f32 %v4860_v50, %v4557_v49  ;;  %v2096_v27 = vadd.f32 %v2095_v6, %v4483_v56 }
 0x2da   : > { %v4906_v4 = vpop.f32.mrf.mxu3  ;;  %v2604_v26 = vpop.xlane.xlu1 %2603 }
 0x2db   : > { %2774 = vst.msk [vmem:[%s4885_s17 + $0x2d0] sm:$0xff] %vm2683_vm3, %v2604_v26  ;;  %v4915_v52 = vpop.f32.mrf.mxu2  ;;  %v2426_v23 = vpop.xlane.xlu0 %2425  ;;  %v2341_v21 = vmax.f32 %v2091_v14, 0.0  ;;  %v2360_v50 = vmax.f32 %v2138_v18, 0.0  ;;  %v2141_v14 = vadd.f32 %v4890_v53, %v4561_v16  ;;  %v5459_v53 = vld [vmem:[#allocation7_spill] sm:$0xff] }
 0x2dc   : > { %2685 = vst.msk [vmem:[%s4885_s17 + $0x8] sm:$0xff] %vm2683_vm3, %v2426_v23  ;;  %v2492_v1 = vpop.xlane.xlu2 %2491  ;;  %v4935_v42 = vpop.f32.mrf.mxu0 }
 0x2dd   : > { %2718 = vst.msk [vmem:[%s4885_s17 + $0x110] sm:$0xff] %vm2683_vm3, %v2492_v1  ;;  %v3668_v1 = vld [vmem:[%s5405_s5 + $0x1f0] sm:$0xff] }
 0x2de   : > { %2054 = vmatmul.bf16.gmra.mxu0 %v3622_v2 }
 0x2df   : > { %2184 = vmatmul.bf16.gmra.mxu2 %v3648_v61  ;;  %2279 = vmatmul.bf16.gmra.mxu3 %v3667_v10  ;;  %v2342_v61 = vmax.f32 %v2093_v62, 0.0  ;;  %v2136_v10 = vadd.f32 %v4847_v41, %v4541_v29  ;;  %v2011_v62 = vadd.f32 %v4878_v58, %v5457_v55 }
 0x2e0   : > { %2447 = vmax.xlane.f32.xlu1 %v2307_v37  ;;  %2625 = vmax.xlane.f32.xlu0 %v2396_v13  ;;  %v2343_v37 = vmax.f32 %v2096_v27, 0.0  ;;  %v2097_v41 = vpop.f32.mrf.mxu1  ;;  %v2361_v27 = vmax.f32 %v2141_v14, 0.0 }
 0x2e1   : > { %2623 = vmax.xlane.f32.xlu2 %v2395_v44  ;;  %v2359_v29 = vmax.f32 %v2136_v10, 0.0  ;;  %v2309_v18 = vmax.f32 %v2011_v62, 0.0  ;;  %v2013_v10 = vadd.f32 %v4900_v17, %v5459_v53  ;;  %v2098_v14 = vadd.f32 %v2097_v41, %v4473_v33  ;;  %v5460_v33 = vld [vmem:[#allocation27_spill] sm:$0xff]  ;;  %v5461_v41 = vld [vmem:[#allocation25_spill] sm:$0xff] }
 0x2e2   : > { %v4930_v7 = vpop.f32.mrf.mxu3 }
 0x2e3   : > { %v4933_v11 = vpop.f32.mrf.mxu2  ;;  %v2428_v28 = vpop.xlane.xlu1 %2427 }
 0x2e4   : > { %2686 = vst.msk [vmem:[%s4885_s17 + $0x10] sm:$0xff] %vm2683_vm3, %v2428_v28  ;;  %v2494_v26 = vpop.xlane.xlu0 %2493  ;;  %v2528_v2 = vpop.xlane.xlu2 %2527 }
 0x2e5   : > { %2719 = vst.msk [vmem:[%s4885_s17 + $0x118] sm:$0xff] %vm2683_vm3, %v2494_v26  ;;  %v4960_v44 = vpop.f32.mrf.mxu0  ;;  %v5458_v26 = vld [vmem:[#allocation3_spill] sm:$0xff] }
 0x2e6   : > { %2736 = vst.msk [vmem:[%s4885_s17 + $0x1a0] sm:$0xff] %vm2683_vm3, %v2528_v2  ;;  %v2008_v2 = vadd.f32 %v4852_v5, %v5458_v26  ;;  %v2236_v5 = vadd.f32 %v4892_v63, %v4732_v35 }
 0x2e8   : > { %2627 = vmax.xlane.f32.xlu1 %v2397_v0  ;;  %2517 = vmax.xlane.f32.xlu0 %v2342_v61  ;;  %v2308_v58 = vmax.f32 %v2008_v2, 0.0 }
 0x2e9   : > { %2515 = vmax.xlane.f32.xlu2 %v2341_v21 }
 0x2ea   : > { %v4946_v36 = vpop.f32.mrf.mxu3 }
 0x2eb   : > { %v4950_v23 = vpop.f32.mrf.mxu2  ;;  %v2496_v13 = vpop.xlane.xlu1 %2495 }
 0x2ec   : > { %2720 = vst.msk [vmem:[%s4885_s17 + $0x120] sm:$0xff] %vm2683_vm3, %v2496_v13  ;;  %v2530_v49 = vpop.xlane.xlu0 %2529  ;;  %v2606_v56 = vpop.xlane.xlu2 %2605 }
 0x2ed   : > { %2737 = vst.msk [vmem:[%s4885_s17 + $0x1a8] sm:$0xff] %vm2683_vm3, %v2530_v49  ;;  %v4982_v16 = vpop.f32.mrf.mxu0  ;;  %v3650_v49 = vld [vmem:[%s5405_s5 + $0x160] sm:$0xff] }
 0x2ee   : > { %2775 = vst.msk [vmem:[%s4885_s17 + $0x2d8] sm:$0xff] %vm2683_vm3, %v2606_v56  ;;  %v3669_v56 = vld [vmem:[%s5405_s5 + $0x1f8] sm:$0xff] }
 0x2ef   : > { %2189 = vmatmul.bf16.gmra.mxu2 %v3649_v57  ;;  %2284 = vmatmul.bf16.gmra.mxu3 %v3668_v1  ;;  %v2233_v57 = vadd.f32 %v4862_v20, %v4725_v60  ;;  %v2100_v1 = vpop.f32.mrf.mxu1  ;;  %v2310_v60 = vmax.f32 %v2013_v10, 0.0 }
 0x2f0   : > { %2519 = vmax.xlane.f32.xlu1 %v2343_v37  ;;  %2553 = vmax.xlane.f32.xlu0 %v2360_v50  ;;  %v2399_v37 = vmax.f32 %v2236_v5, 0.0  ;;  %v2101_v55 = vadd.f32 %v2100_v1, %v4487_v22  ;;  %v5462_v5 = vld [vmem:[#allocation26_spill] sm:$0xff] }
 0x2f1   : > { %2551 = vmax.xlane.f32.xlu2 %v2359_v29  ;;  %v2398_v20 = vmax.f32 %v2233_v57, 0.0  ;;  %v2238_v29 = vadd.f32 %v4906_v4, %v4748_v46  ;;  %v2344_v46 = vmax.f32 %v2098_v14, 0.0  ;;  %v2146_v4 = vadd.f32 %v4933_v11, %v5460_v33 }
 0x2f2   : > { %v4970_v28 = vpop.f32.mrf.mxu3  ;;  %v2143_v53 = vadd.f32 %v4915_v52, %v5462_v5  ;;  %v5463_v52 = vld [vmem:[#allocation8_spill] sm:$0xff] }
 0x2f3   : > { %v4974_v0 = vpop.f32.mrf.mxu2  ;;  %v2532_v61 = vpop.xlane.xlu1 %2531 }
 0x2f4   : > { %2738 = vst.msk [vmem:[%s4885_s17 + $0x1b0] sm:$0xff] %vm2683_vm3, %v2532_v61  ;;  %v2608_v21 = vpop.xlane.xlu0 %2607  ;;  %v2430_v6 = vpop.xlane.xlu2 %2429  ;;  %v2362_v11 = vmax.f32 %v2143_v53, 0.0 }
 0x2f5   : > { %2776 = vst.msk [vmem:[%s4885_s17 + $0x2e0] sm:$0xff] %vm2683_vm3, %v2608_v21  ;;  %v5009_v62 = vpop.f32.mrf.mxu0 }
 0x2f6   : > { %2687 = vst.msk [vmem:[%s4885_s17 + $0x18] sm:$0xff] %vm2683_vm3, %v2430_v6  ;;  %v2400_v6 = vmax.f32 %v2238_v29, 0.0  ;;  %v5465_v29 = vld [vmem:[#allocation6_spill] sm:$0xff] }
 0x2f7   : > { %v2102_v22 = vpop.f32.mrf.mxu1 }
 0x2f8   : > { %2555 = vmax.xlane.f32.xlu1 %v2361_v27  ;;  %2451 = vmax.xlane.f32.xlu0 %v2309_v18  ;;  %v2345_v18 = vmax.f32 %v2101_v55, 0.0  ;;  %v2016_v55 = vadd.f32 %v4935_v42, %v5465_v29  ;;  %v2243_v42 = vadd.f32 %v4946_v36, %v4750_v51 }
 0x2f9   : > { %2449 = vmax.xlane.f32.xlu2 %v2308_v58  ;;  %v2103_v58 = vadd.f32 %v2102_v22, %v5461_v41 }
 0x2fa   : > { %v4998_v50 = vpop.f32.mrf.mxu3 }
 0x2fb   : > { %v4990_v13 = vpop.f32.mrf.mxu2  ;;  %v2610_v35 = vpop.xlane.xlu1 %2609 }
 0x2fc   : > { %2777 = vst.msk [vmem:[%s4885_s17 + $0x2e8] sm:$0xff] %vm2683_vm3, %v2610_v35  ;;  %v2500_v63 = vpop.xlane.xlu0 %2499  ;;  %v2498_v17 = vpop.xlane.xlu2 %2497  ;;  %v2363_v35 = vmax.f32 %v2146_v4, 0.0  ;;  %v2241_v4 = vadd.f32 %v4930_v7, %v4734_v24  ;;  %v2246_v24 = vadd.f32 %v4970_v28, %v4759_v47  ;;  %v5467_v7 = vld [vmem:[#allocation30_spill] sm:$0xff]  ;;  %v5469_v28 = vld [vmem:[#allocation11_spill] sm:$0xff] }
 0x2fd   : > { %2722 = vst.msk [vmem:[%s4885_s17 + $0x130] sm:$0xff] %vm2683_vm3, %v2500_v63  ;;  %v5029_v57 = vpop.f32.mrf.mxu0  ;;  %v2346_v63 = vmax.f32 %v2103_v58, 0.0 }
 0x2fe   : > { %2721 = vst.msk [vmem:[%s4885_s17 + $0x128] sm:$0xff] %vm2683_vm3, %v2498_v17  ;;  %v2401_v51 = vmax.f32 %v2241_v4, 0.0 }
 0x2ff   : > { %2194 = vmatmul.bf16.gmra.mxu2 %v3650_v49  ;;  %2289 = vmatmul.bf16.gmra.mxu3 %v3669_v56 }
 0x300   : > { %2453 = vmax.xlane.f32.xlu1 %v2310_v60  ;;  %2631 = vmax.xlane.f32.xlu0 %v2399_v37  ;;  %v2018_v37 = vadd.f32 %v4960_v44, %v5463_v52  ;;  %v5464_v60 = vld [vmem:[#allocation29_spill] sm:$0xff]  ;;  %v2311_v44 = vmax.f32 %v2016_v55, 0.0 }
 0x301   : > { %2629 = vmax.xlane.f32.xlu2 %v2398_v20  ;;  %v2148_v20 = vadd.f32 %v4950_v23, %v5464_v60  ;;  %v5466_v23 = vld [vmem:[#allocation10_spill] sm:$0xff] }
 0x302   : > { %v5016_v27 = vpop.f32.mrf.mxu3  ;;  %v2021_v22 = vadd.f32 %v4982_v16, %v5466_v23  ;;  %v2153_v16 = vadd.f32 %v4990_v13, %v5467_v7  ;;  %v5470_v13 = vld [vmem:[#allocation32_spill] sm:$0xff] }
 0x303   : > { %v5012_v26 = vpop.f32.mrf.mxu2  ;;  %v2502_v2 = vpop.xlane.xlu1 %2501 }
 0x304   : > { %2723 = vst.msk [vmem:[%s4885_s17 + $0x138] sm:$0xff] %vm2683_vm3, %v2502_v2  ;;  %v2536_v61 = vpop.xlane.xlu0 %2535  ;;  %v2534_v21 = vpop.xlane.xlu2 %2533  ;;  %v2366_v29 = vmax.f32 %v2153_v16, 0.0  ;;  %v2156_v55 = vadd.f32 %v5012_v26, %v5470_v13  ;;  %v5472_v26 = vld [vmem:[#allocation13_spill] sm:$0xff] }
 0x305   : > { %2740 = vst.msk [vmem:[%s4885_s17 + $0x1c0] sm:$0xff] %vm2683_vm3, %v2536_v61 }
 0x306   : > { %2739 = vst.msk [vmem:[%s4885_s17 + $0x1b8] sm:$0xff] %vm2683_vm3, %v2534_v21 }
 0x308   : > { %2633 = vmax.xlane.f32.xlu1 %v2400_v6  ;;  %2523 = vmax.xlane.f32.xlu0 %v2345_v18  ;;  %v2312_v6 = vmax.f32 %v2018_v37, 0.0  ;;  %v2364_v18 = vmax.f32 %v2148_v20, 0.0  ;;  %v2403_v20 = vmax.f32 %v2246_v24, 0.0 }
 0x309   : > { %2521 = vmax.xlane.f32.xlu2 %v2344_v46  ;;  %v2027_v46 = vpop.f32.mrf.mxu0 }
 0x30a   : > { %v5037_v17 = vpop.f32.mrf.mxu3 }
 0x30b   : > { %v5027_v10 = vpop.f32.mrf.mxu2  ;;  %v2538_v1 = vpop.xlane.xlu1 %2537 }
 0x30c   : > { %2741 = vst.msk [vmem:[%s4885_s17 + $0x1c8] sm:$0xff] %vm2683_vm3, %v2538_v1  ;;  %v2434_v49 = vpop.xlane.xlu0 %2433  ;;  %v2432_v56 = vpop.xlane.xlu2 %2431  ;;  %v2402_v1 = vmax.f32 %v2243_v42, 0.0 }
 0x30d   : > { %2689 = vst.msk [vmem:[%s4885_s17 + $0x28] sm:$0xff] %vm2683_vm3, %v2434_v49  ;;  %v2313_v49 = vmax.f32 %v2021_v22, 0.0  ;;  %v2367_v22 = vmax.f32 %v2156_v55, 0.0  ;;  %v5477_v55 = vld [vmem:[#allocation12_spill] sm:$0xff] }
 0x30e   : > { %2688 = vst.msk [vmem:[%s4885_s17 + $0x20] sm:$0xff] %vm2683_vm3, %v2432_v56  ;;  %v5468_v56 = vld [vmem:[#allocation28_spill] sm:$0xff] }
 0x310   : > { %2525 = vmax.xlane.f32.xlu1 %v2346_v63  ;;  %2559 = vmax.xlane.f32.xlu0 %v2363_v35  ;;  %v2151_v35 = vadd.f32 %v4974_v0, %v5468_v56  ;;  %v2026_v0 = vadd.f32 %v5029_v57, %v5469_v28 }
 0x311   : > { %2557 = vmax.xlane.f32.xlu2 %v2362_v11  ;;  %v5069_v36 = vpop.f32.mrf.mxu0 }
 0x312   : > { %v5057_v33 = vpop.f32.mrf.mxu3  ;;  %v2365_v47 = vmax.f32 %v2151_v35, 0.0  ;;  %v2315_v23 = vmax.f32 %v2026_v0, 0.0 }
 0x313   : > { %v5045_v14 = vpop.f32.mrf.mxu2  ;;  %v2436_v2 = vpop.xlane.xlu1 %2435 }
 0x314   : > { %2690 = vst.msk [vmem:[%s4885_s17 + $0x30] sm:$0xff] %vm2683_vm3, %v2436_v2  ;;  %v2614_v61 = vpop.xlane.xlu0 %2613  ;;  %v2612_v21 = vpop.xlane.xlu2 %2611 }
 0x315   : > { %2779 = vst.msk [vmem:[%s4885_s17 + $0x2f8] sm:$0xff] %vm2683_vm3, %v2614_v61  ;;  %v5471_v61 = vld [vmem:[#allocation9_spill] sm:$0xff] }
 0x316   : > { %2778 = vst.msk [vmem:[%s4885_s17 + $0x2f0] sm:$0xff] %vm2683_vm3, %v2612_v21  ;;  %v2023_v21 = vadd.f32 %v5009_v62, %v5471_v61  ;;  %v2251_v62 = vadd.f32 %v5016_v27, %v4761_v54  ;;  %v2031_v61 = vadd.f32 %v5069_v36, %v5477_v55 }
 0x318   : > { %2561 = vmax.xlane.f32.xlu1 %v2364_v18  ;;  %2457 = vmax.xlane.f32.xlu0 %v2312_v6  ;;  %v2314_v57 = vmax.f32 %v2023_v21, 0.0  ;;  %v2405_v7 = vmax.f32 %v2251_v62, 0.0 }
 0x319   : > { %2455 = vmax.xlane.f32.xlu2 %v2311_v44  ;;  %v2032_v2 = vpop.f32.mrf.mxu0 }
 0x31a   : > { %v5079_v11 = vpop.f32.mrf.mxu3 }
 0x31b   : > { %v5061_v41 = vpop.f32.mrf.mxu2  ;;  %v2616_v58 = vpop.xlane.xlu1 %2615  ;;  %v2258_v36 = vadd.f32 %v5079_v11, %v4783_v43 }
 0x31c   : > { %2780 = vst.msk [vmem:[%s4885_s17 + $0x300] sm:$0xff] %vm2683_vm3, %v2616_v58  ;;  %v2506_v5 = vpop.xlane.xlu0 %2505  ;;  %v2504_v53 = vpop.xlane.xlu2 %2503  ;;  %v2028_v58 = vadd.f32 %v2027_v46, %v5472_v26  ;;  %v5474_v46 = vld [vmem:[#allocation31_spill] sm:$0xff]  ;;  %v2256_v26 = vadd.f32 %v5057_v33, %v4777_v32  ;;  %v5479_v33 = vld [vmem:[#allocation36_spill] sm:$0xff] }
 0x31d   : > { %2725 = vst.msk [vmem:[%s4885_s17 + $0x148] sm:$0xff] %vm2683_vm3, %v2506_v5  ;;  %v2248_v5 = vadd.f32 %v4998_v50, %v4752_v40  ;;  %v2253_v40 = vadd.f32 %v5037_v17, %v4779_v12  ;;  %v5473_v50 = vld [vmem:[#allocation33_spill] sm:$0xff]  ;;  %v2158_v35 = vadd.f32 %v5027_v10, %v5474_v46  ;;  %v5475_v10 = vld [vmem:[#allocation14_spill] sm:$0xff] }
 0x31e   : > { %2724 = vst.msk [vmem:[%s4885_s17 + $0x140] sm:$0xff] %vm2683_vm3, %v2504_v53  ;;  %v2316_v16 = vmax.f32 %v2028_v58, 0.0  ;;  %v2161_v27 = vadd.f32 %v5045_v14, %v5473_v50  ;;  %v2033_v17 = vadd.f32 %v2032_v2, %v5475_v10  ;;  %v5476_v14 = vld [vmem:[#allocation35_spill] sm:$0xff]  ;;  %v2317_v2 = vmax.f32 %v2031_v61, 0.0 }
 0x31f   : > { %v2404_v56 = vmax.f32 %v2248_v5, 0.0  ;;  %v2368_v12 = vmax.f32 %v2158_v35, 0.0  ;;  %v2163_v0 = vadd.f32 %v5061_v41, %v5476_v14  ;;  %v2407_v43 = vmax.f32 %v2256_v26, 0.0 }
 0x320   : > { %2459 = vmax.xlane.f32.xlu1 %v2313_v49  ;;  %2637 = vmax.xlane.f32.xlu0 %v2402_v1 }
 0x321   : > { %2635 = vmax.xlane.f32.xlu2 %v2401_v51  ;;  %v2035_v1 = vpop.f32.mrf.mxu0 }
 0x322   : > { %v5097_v4 = vpop.f32.mrf.mxu3 }
 0x323   : > { %v5077_v63 = vpop.f32.mrf.mxu2  ;;  %v2508_v52 = vpop.xlane.xlu1 %2507  ;;  %v2261_v32 = vadd.f32 %v5097_v4, %v4795_v39 }
 0x324   : > { %2726 = vst.msk [vmem:[%s4885_s17 + $0x150] sm:$0xff] %vm2683_vm3, %v2508_v52  ;;  %v2542_v37 = vpop.xlane.xlu0 %2541  ;;  %v2540_v60 = vpop.xlane.xlu2 %2539 }
 0x325   : > { %2743 = vst.msk [vmem:[%s4885_s17 + $0x1d8] sm:$0xff] %vm2683_vm3, %v2542_v37  ;;  %v2409_v35 = vmax.f32 %v2261_v32, 0.0 }
 0x326   : > { %2742 = vst.msk [vmem:[%s4885_s17 + $0x1d0] sm:$0xff] %vm2683_vm3, %v2540_v60 }
 0x328   : > { %2639 = vmax.xlane.f32.xlu1 %v2403_v20  ;;  %2565 = vmax.xlane.f32.xlu0 %v2366_v29  ;;  %v2406_v29 = vmax.f32 %v2253_v40, 0.0 }
 0x329   : > { %2563 = vmax.xlane.f32.xlu2 %v2365_v47  ;;  %v2369_v47 = vmax.f32 %v2161_v27, 0.0  ;;  %v2037_v28 = vpop.f32.mrf.mxu0 }
 0x32a   : > { %v5116_v54 = vpop.f32.mrf.mxu3 }
 0x32b   : > { %v5093_v6 = vpop.f32.mrf.mxu2  ;;  %v2544_v18 = vpop.xlane.xlu1 %2543 }
 0x32c   : > { %2744 = vst.msk [vmem:[%s4885_s17 + $0x1e0] sm:$0xff] %vm2683_vm3, %v2544_v18  ;;  %v2440_v44 = vpop.xlane.xlu0 %2439  ;;  %v2438_v42 = vpop.xlane.xlu2 %2437  ;;  %v2168_v11 = vadd.f32 %v5093_v6, %v5479_v33 }
 0x32d   : > { %2692 = vst.msk [vmem:[%s4885_s17 + $0x40] sm:$0xff] %vm2683_vm3, %v2440_v44 }
 0x32e   : > { %2691 = vst.msk [vmem:[%s4885_s17 + $0x38] sm:$0xff] %vm2683_vm3, %v2438_v42 }
 0x330   : > { %2567 = vmax.xlane.f32.xlu1 %v2367_v22  ;;  %2463 = vmax.xlane.f32.xlu0 %v2315_v23  ;;  %v2318_v23 = vmax.f32 %v2033_v17, 0.0  ;;  %v2370_v22 = vmax.f32 %v2163_v0, 0.0 }
 0x331   : > { %2461 = vmax.xlane.f32.xlu2 %v2314_v57  ;;  %v2040_v41 = vpop.f32.mrf.mxu0  ;;  %v5478_v57 = vld [vmem:[#allocation16_spill] sm:$0xff] }
 0x332   : > { %v5135_v13 = vpop.f32.mrf.mxu3  ;;  %v2036_v62 = vadd.f32 %v2035_v1, %v5478_v57 }
 0x333   : > { %v5108_v53 = vpop.f32.mrf.mxu2  ;;  %v2442_v49 = vpop.xlane.xlu1 %2441 }
 0x334   : > { %2693 = vst.msk [vmem:[%s4885_s17 + $0x48] sm:$0xff] %vm2683_vm3, %v2442_v49  ;;  %v2620_v51 = vpop.xlane.xlu0 %2619  ;;  %v2618_v24 = vpop.xlane.xlu2 %2617 }
 0x335   : > { %2782 = vst.msk [vmem:[%s4885_s17 + $0x310] sm:$0xff] %vm2683_vm3, %v2620_v51 }
 0x336   : > { %2781 = vst.msk [vmem:[%s4885_s17 + $0x308] sm:$0xff] %vm2683_vm3, %v2618_v24  ;;  %v2408_v24 = vmax.f32 %v2258_v36, 0.0 }
 0x338   : > { %2465 = vmax.xlane.f32.xlu1 %v2316_v16  ;;  %2643 = vmax.xlane.f32.xlu0 %v2405_v7  ;;  %v2319_v7 = vmax.f32 %v2036_v62, 0.0 }
 0x339   : > { %2641 = vmax.xlane.f32.xlu2 %v2404_v56  ;;  %v2042_v1 = vpop.f32.mrf.mxu0  ;;  %v5480_v56 = vld [vmem:[#allocation34_spill] sm:$0xff] }
 0x33a   : > { %v5152_v58 = vpop.f32.mrf.mxu3  ;;  %v2166_v40 = vadd.f32 %v5077_v63, %v5480_v56  ;;  %v5481_v63 = vld [vmem:[#allocation17_spill] sm:$0xff] }
 0x33b   : > { %v5124_v52 = vpop.f32.mrf.mxu2  ;;  %v2622_v37 = vpop.xlane.xlu1 %2621  ;;  %v2041_v4 = vadd.f32 %v2040_v41, %v5481_v63 }
 0x33c   : > { %2783 = vst.msk [vmem:[%s4885_s17 + $0x318] sm:$0xff] %vm2683_vm3, %v2622_v37  ;;  %v2512_v60 = vpop.xlane.xlu0 %2511  ;;  %v2510_v20 = vpop.xlane.xlu2 %2509  ;;  %v2372_v37 = vmax.f32 %v2168_v11, 0.0  ;;  %v2371_v39 = vmax.f32 %v2166_v40, 0.0  ;;  %v5489_v40 = vld [vmem:[#allocation18_spill] sm:$0xff] }
 0x33d   : > { %2728 = vst.msk [vmem:[%s4885_s17 + $0x160] sm:$0xff] %vm2683_vm3, %v2512_v60  ;;  %v2321_v55 = vmax.f32 %v2041_v4, 0.0 }
 0x33e   : > { %2727 = vst.msk [vmem:[%s4885_s17 + $0x158] sm:$0xff] %vm2683_vm3, %v2510_v20  ;;  %v5482_v20 = vld [vmem:[#allocation38_spill] sm:$0xff] }
 0x340   : > { %2645 = vmax.xlane.f32.xlu1 %v2406_v29  ;;  %2571 = vmax.xlane.f32.xlu0 %v2369_v47  ;;  %v2171_v29 = vadd.f32 %v5108_v53, %v5482_v20  ;;  %v5483_v47 = vld [vmem:[#allocation15_spill] sm:$0xff]  ;;  %v2266_v53 = vadd.f32 %v5135_v13, %v4806_v25 }
 0x341   : > { %2569 = vmax.xlane.f32.xlu2 %v2368_v12  ;;  %v2038_v12 = vadd.f32 %v2037_v28, %v5483_v47  ;;  %v2045_v10 = vpop.f32.mrf.mxu0  ;;  %v5484_v28 = vld [vmem:[#allocation19_spill] sm:$0xff] }
 0x342   : > { %v5170_v60 = vpop.f32.mrf.mxu3  ;;  %v2373_v61 = vmax.f32 %v2171_v29, 0.0  ;;  %v2411_v57 = vmax.f32 %v2266_v53, 0.0  ;;  %v5485_v25 = vld [vmem:[#allocation39_spill] sm:$0xff]  ;;  %v5490_v29 = vld [vmem:[#allocation22_spill] sm:$0xff] }
 0x343   : > { %v5139_v21 = vpop.f32.mrf.mxu2  ;;  %v2514_v18 = vpop.xlane.xlu1 %2513 }
 0x344   : > { %2729 = vst.msk [vmem:[%s4885_s17 + $0x168] sm:$0xff] %vm2683_vm3, %v2514_v18  ;;  %v2548_v44 = vpop.xlane.xlu0 %2547  ;;  %v2546_v42 = vpop.xlane.xlu2 %2545  ;;  %v2320_v18 = vmax.f32 %v2038_v12, 0.0 }
 0x345   : > { %2746 = vst.msk [vmem:[%s4885_s17 + $0x1f0] sm:$0xff] %vm2683_vm3, %v2548_v44 }
 0x346   : > { %2745 = vst.msk [vmem:[%s4885_s17 + $0x1e8] sm:$0xff] %vm2683_vm3, %v2546_v42  ;;  %v2043_v42 = vadd.f32 %v2042_v1, %v5484_v28  ;;  %v5488_v1 = vld [vmem:[#allocation41_spill] sm:$0xff]  ;;  %v5492_v28 = vld [vmem:[#allocation40_spill] sm:$0xff] }
 0x348   : > { %2573 = vmax.xlane.f32.xlu1 %v2370_v22  ;;  %2469 = vmax.xlane.f32.xlu0 %v2318_v23  ;;  %v2263_v22 = vadd.f32 %v5116_v54, %v4786_v31  ;;  %v2322_v62 = vmax.f32 %v2043_v42, 0.0  ;;  %v2268_v31 = vadd.f32 %v5152_v58, %v4818_v8  ;;  %v2176_v54 = vadd.f32 %v5139_v21, %v5485_v25 }
 0x349   : > { %2467 = vmax.xlane.f32.xlu2 %v2317_v2  ;;  %v2047_v26 = vpop.f32.mrf.mxu0 }
 0x34a   : > { %v2272_v44 = vpop.f32.mrf.mxu3  ;;  %v2412_v33 = vmax.f32 %v2268_v31, 0.0  ;;  %v2375_v11 = vmax.f32 %v2176_v54, 0.0  ;;  %v5495_v54 = vld [vmem:[#allocation21_spill] sm:$0xff] }
 0x34b   : > { %v2550_v5 = vpop.xlane.xlu1 %2549  ;;  %v5156_v16 = vpop.f32.mrf.mxu2 }
 0x34c   : > { %2747 = vst.msk [vmem:[%s4885_s17 + $0x1f8] sm:$0xff] %vm2683_vm3, %v2550_v5  ;;  %v2446_v49 = vpop.xlane.xlu0 %2445  ;;  %v2444_v51 = vpop.xlane.xlu2 %2443  ;;  %v2410_v5 = vmax.f32 %v2263_v22, 0.0  ;;  %v2178_v56 = vadd.f32 %v5156_v16, %v5488_v1  ;;  %v2273_v16 = vadd.f32 %v2272_v44, %v4820_v59 }
 0x34d   : > { %2695 = vst.msk [vmem:[%s4885_s17 + $0x58] sm:$0xff] %vm2683_vm3, %v2446_v49  ;;  %v5486_v49 = vld [vmem:[#allocation37_spill] sm:$0xff] }
 0x34e   : > { %2694 = vst.msk [vmem:[%s4885_s17 + $0x50] sm:$0xff] %vm2683_vm3, %v2444_v51  ;;  %v2173_v51 = vadd.f32 %v5124_v52, %v5486_v49  ;;  %v5487_v52 = vld [vmem:[#allocation20_spill] sm:$0xff]  ;;  %v2376_v63 = vmax.f32 %v2178_v56, 0.0 }
 0x34f   : > { %v2048_v58 = vadd.f32 %v2047_v26, %v5487_v52 }
 0x350   : > { %2471 = vmax.xlane.f32.xlu1 %v2319_v7  ;;  %2649 = vmax.xlane.f32.xlu0 %v2408_v24  ;;  %v2374_v8 = vmax.f32 %v2173_v51, 0.0 }
 0x351   : > { %2647 = vmax.xlane.f32.xlu2 %v2407_v43  ;;  %v2050_v21 = vpop.f32.mrf.mxu0 }
 0x352   : > { %v2275_v13 = vpop.f32.mrf.mxu3  ;;  %v2051_v47 = vadd.f32 %v2050_v21, %v5490_v29 }
 0x353   : > { %v2448_v50 = vpop.xlane.xlu1 %2447  ;;  %v5176_v6 = vpop.f32.mrf.mxu2 }
 0x354   : > { %2696 = vst.msk [vmem:[%s4885_s17 + $0x60] sm:$0xff] %vm2683_vm3, %v2448_v50  ;;  %v2626_v27 = vpop.xlane.xlu0 %2625  ;;  %v2624_v46 = vpop.xlane.xlu2 %2623  ;;  %v2046_v50 = vadd.f32 %v2045_v10, %v5489_v40  ;;  %v2271_v10 = vadd.f32 %v5170_v60, %v4808_v48  ;;  %v2276_v48 = vadd.f32 %v2275_v13, %v4841_v15  ;;  %v5491_v60 = vld [vmem:[#allocation42_spill] sm:$0xff]  ;;  %v2181_v42 = vadd.f32 %v5176_v6, %v5492_v28  ;;  %v5493_v6 = vld [vmem:[#allocation23_spill] sm:$0xff] }
 0x355   : > { %2785 = vst.msk [vmem:[%s4885_s17 + $0x328] sm:$0xff] %vm2683_vm3, %v2626_v27 }
 0x356   : > { %2784 = vst.msk [vmem:[%s4885_s17 + $0x320] sm:$0xff] %vm2683_vm3, %v2624_v46  ;;  %v2323_v20 = vmax.f32 %v2046_v50, 0.0  ;;  %v2413_v53 = vmax.f32 %v2271_v10, 0.0  ;;  %v2377_v26 = vmax.f32 %v2181_v42, 0.0 }
 0x358   : > { %2651 = vmax.xlane.f32.xlu1 %v2409_v35  ;;  %2577 = vmax.xlane.f32.xlu0 %v2372_v37 }
 0x359   : > { %2575 = vmax.xlane.f32.xlu2 %v2371_v39  ;;  %v2324_v39 = vmax.f32 %v2048_v58, 0.0  ;;  %v2052_v12 = vpop.f32.mrf.mxu0 }
 0x35a   : > { %v5219_v27 = vpop.f32.mrf.mxu3  ;;  %v2053_v13 = vadd.f32 %v2052_v12, %v5495_v54 }
 0x35b   : > { %v2628_v17 = vpop.xlane.xlu1 %2627  ;;  %v5191_v23 = vpop.f32.mrf.mxu2  ;;  %v2278_v58 = vadd.f32 %v5219_v27, %v4839_v38 }
 0x35c   : > { %2786 = vst.msk [vmem:[%s4885_s17 + $0x330] sm:$0xff] %vm2683_vm3, %v2628_v17  ;;  %v2518_v14 = vpop.xlane.xlu0 %2517  ;;  %v2516_v0 = vpop.xlane.xlu2 %2515  ;;  %v2183_v44 = vadd.f32 %v5191_v23, %v5491_v60 }
 0x35d   : > { %2731 = vst.msk [vmem:[%s4885_s17 + $0x178] sm:$0xff] %vm2683_vm3, %v2518_v14 }
 0x35e   : > { %2730 = vst.msk [vmem:[%s4885_s17 + $0x170] sm:$0xff] %vm2683_vm3, %v2516_v0 }
 0x360   : > { %2579 = vmax.xlane.f32.xlu1 %v2373_v61  ;;  %2475 = vmax.xlane.f32.xlu0 %v2321_v55  ;;  %v2414_v55 = vmax.f32 %v2273_v16, 0.0  ;;  %v2325_v61 = vmax.f32 %v2051_v47, 0.0 }
 0x361   : > { %2473 = vmax.xlane.f32.xlu2 %v2320_v18  ;;  %v2055_v22 = vpop.f32.mrf.mxu0 }
 0x362   : > { %v2280_v18 = vpop.f32.mrf.mxu3  ;;  %v2056_v23 = vadd.f32 %v2055_v22, %v5493_v6  ;;  %v5501_v22 = vld [vmem:[#allocation46_spill] sm:$0xff] }
 0x363   : > { %v2520_v2 = vpop.xlane.xlu1 %2519  ;;  %v5207_v24 = vpop.f32.mrf.mxu2 }
 0x364   : > { %2732 = vst.msk [vmem:[%s4885_s17 + $0x180] sm:$0xff] %vm2683_vm3, %v2520_v2  ;;  %v2554_v41 = vpop.xlane.xlu0 %2553  ;;  %v2552_v36 = vpop.xlane.xlu2 %2551 }
 0x365   : > { %2749 = vst.msk [vmem:[%s4885_s17 + $0x208] sm:$0xff] %vm2683_vm3, %v2554_v41 }
 0x366   : > { %2748 = vst.msk [vmem:[%s4885_s17 + $0x200] sm:$0xff] %vm2683_vm3, %v2552_v36 }
 0x368   : > { %2477 = vmax.xlane.f32.xlu1 %v2322_v62  ;;  %2655 = vmax.xlane.f32.xlu0 %v2411_v57  ;;  %v2415_v57 = vmax.f32 %v2276_v48, 0.0  ;;  %v2378_v62 = vmax.f32 %v2183_v44, 0.0 }
 0x369   : > { %2653 = vmax.xlane.f32.xlu2 %v2410_v5  ;;  %v5494_v5 = vld [vmem:[#allocation44_spill] sm:$0xff] }
 0x36a   : > { %v2282_v15 = vpop.f32.mrf.mxu3  ;;  %v2186_v31 = vadd.f32 %v5207_v24, %v5494_v5  ;;  %v2281_v24 = vadd.f32 %v2280_v18, %v4843_v45  ;;  %v5497_v45 = vld [vmem:[#allocation45_spill] sm:$0xff] }
 0x36b   : > { %v2556_v7 = vpop.xlane.xlu1 %2555  ;;  %v5223_v4 = vpop.f32.mrf.mxu2  ;;  %v2283_v38 = vadd.f32 %v2282_v15, %v4856_v19  ;;  %v5499_v19 = vld [vmem:[#allocation47_spill] sm:$0xff] }
 0x36c   : > { %2750 = vst.msk [vmem:[%s4885_s17 + $0x210] sm:$0xff] %vm2683_vm3, %v2556_v7  ;;  %v2452_v43 = vpop.xlane.xlu0 %2451  ;;  %v2450_v32 = vpop.xlane.xlu2 %2449 }
 0x36d   : > { %2698 = vst.msk [vmem:[%s4885_s17 + $0x70] sm:$0xff] %vm2683_vm3, %v2452_v43  ;;  %v2327_v43 = vmax.f32 %v2056_v23, 0.0  ;;  %v2418_v12 = vmax.f32 %v2283_v38, 0.0 }
 0x36e   : > { %2697 = vst.msk [vmem:[%s4885_s17 + $0x68] sm:$0xff] %vm2683_vm3, %v2450_v32  ;;  %v2379_v32 = vmax.f32 %v2186_v31, 0.0 }
 0x370   : > { %2657 = vmax.xlane.f32.xlu1 %v2412_v33  ;;  %2583 = vmax.xlane.f32.xlu0 %v2375_v11  ;;  %v2326_v33 = vmax.f32 %v2053_v13, 0.0  ;;  %v2057_v11 = vpop.f32.mrf.mxu0 }
 0x371   : > { %2581 = vmax.xlane.f32.xlu2 %v2374_v8  ;;  %v5496_v8 = vld [vmem:[#allocation24_spill] sm:$0xff] }
 0x372   : > { %v2058_v21 = vadd.f32 %v2057_v11, %v5496_v8  ;;  %v2285_v52 = vpop.f32.mrf.mxu3 }
 0x373   : > { %v2454_v46 = vpop.xlane.xlu1 %2453  ;;  %v2190_v59 = vpop.f32.mrf.mxu2 }
 0x374   : > { %2699 = vst.msk [vmem:[%s4885_s17 + $0x78] sm:$0xff] %vm2683_vm3, %v2454_v46  ;;  %v2632_v35 = vpop.xlane.xlu0 %2631  ;;  %v2630_v37 = vpop.xlane.xlu2 %2629  ;;  %v2417_v46 = vmax.f32 %v2281_v24, 0.0  ;;  %v2191_v27 = vadd.f32 %v2190_v59, %v5497_v45 }
 0x375   : > { %2788 = vst.msk [vmem:[%s4885_s17 + $0x340] sm:$0xff] %vm2683_vm3, %v2632_v35  ;;  %v2328_v35 = vmax.f32 %v2058_v21, 0.0 }
 0x376   : > { %2787 = vst.msk [vmem:[%s4885_s17 + $0x338] sm:$0xff] %vm2683_vm3, %v2630_v37  ;;  %v2416_v37 = vmax.f32 %v2278_v58, 0.0  ;;  %v2381_v10 = vmax.f32 %v2191_v27, 0.0 }
 0x378   : > { %2585 = vmax.xlane.f32.xlu1 %v2376_v63  ;;  %2481 = vmax.xlane.f32.xlu0 %v2324_v39  ;;  %v5498_v39 = vld [vmem:[#allocation43_spill] sm:$0xff] }
 0x379   : > { %2479 = vmax.xlane.f32.xlu2 %v2323_v20  ;;  %v2188_v63 = vadd.f32 %v5223_v4, %v5498_v39 }
 0x37a   : > { %v2287_v20 = vpop.f32.mrf.mxu3 }
 0x37b   : > { %v2634_v17 = vpop.xlane.xlu1 %2633  ;;  %v2192_v25 = vpop.f32.mrf.mxu2 }
 0x37c   : > { %2789 = vst.msk [vmem:[%s4885_s17 + $0x348] sm:$0xff] %vm2683_vm3, %v2634_v17  ;;  %v2524_v14 = vpop.xlane.xlu0 %2523  ;;  %v2522_v0 = vpop.xlane.xlu2 %2521  ;;  %v2380_v17 = vmax.f32 %v2188_v63, 0.0  ;;  %v2193_v4 = vadd.f32 %v2192_v25, %v5499_v19 }
 0x37d   : > { %2734 = vst.msk [vmem:[%s4885_s17 + $0x190] sm:$0xff] %vm2683_vm3, %v2524_v14 }
 0x37e   : > { %2733 = vst.msk [vmem:[%s4885_s17 + $0x188] sm:$0xff] %vm2683_vm3, %v2522_v0  ;;  %v5500_v0 = vld [vmem:[#allocation48_spill] sm:$0xff]  ;;  %v2382_v48 = vmax.f32 %v2193_v4, 0.0 }
 0x380   : > { %2483 = vmax.xlane.f32.xlu1 %v2325_v61  ;;  %2661 = vmax.xlane.f32.xlu0 %v2414_v55  ;;  %v2286_v61 = vadd.f32 %v2285_v52, %v4854_v9  ;;  %v2288_v9 = vadd.f32 %v2287_v20, %v4875_v34 }
 0x381   : > { %2659 = vmax.xlane.f32.xlu2 %v2413_v53 }
 0x382   : > { %v2290_v60 = vpop.f32.mrf.mxu3  ;;  %v2419_v28 = vmax.f32 %v2286_v61, 0.0 }
 0x383   : > { %v2526_v2 = vpop.xlane.xlu1 %2525  ;;  %v2195_v1 = vpop.f32.mrf.mxu2  ;;  %v2291_v42 = vadd.f32 %v2290_v60, %v4896_v3 }
 0x384   : > { %2735 = vst.msk [vmem:[%s4885_s17 + $0x198] sm:$0xff] %vm2683_vm3, %v2526_v2  ;;  %v2560_v41 = vpop.xlane.xlu0 %2559  ;;  %v2558_v36 = vpop.xlane.xlu2 %2557  ;;  %v2196_v2 = vadd.f32 %v2195_v1, %v5501_v22 }
 0x385   : > { %2752 = vst.msk [vmem:[%s4885_s17 + $0x220] sm:$0xff] %vm2683_vm3, %v2560_v41 }
 0x386   : > { %2751 = vst.msk [vmem:[%s4885_s17 + $0x218] sm:$0xff] %vm2683_vm3, %v2558_v36  ;;  %v2383_v15 = vmax.f32 %v2196_v2, 0.0 }
 0x388   : > { %2663 = vmax.xlane.f32.xlu1 %v2415_v57  ;;  %2589 = vmax.xlane.f32.xlu0 %v2378_v62  ;;  %v2420_v62 = vmax.f32 %v2288_v9, 0.0 }
 0x389   : > { %2587 = vmax.xlane.f32.xlu2 %v2377_v26  ;;  %v2421_v26 = vmax.f32 %v2291_v42, 0.0 }
 0x38a   : > { %v2292_v34 = vpop.f32.mrf.mxu3 }
 0x38b   : > { %v2562_v49 = vpop.xlane.xlu1 %2561  ;;  %v2197_v14 = vpop.f32.mrf.mxu2  ;;  %v2293_v3 = vadd.f32 %v2292_v34, %v4880_v30 }
 0x38c   : > { %2753 = vst.msk [vmem:[%s4885_s17 + $0x228] sm:$0xff] %vm2683_vm3, %v2562_v49  ;;  %v2458_v51 = vpop.xlane.xlu0 %2457  ;;  %v2456_v7 = vpop.xlane.xlu2 %2455  ;;  %v2198_v55 = vadd.f32 %v2197_v14, %v5500_v0 }
 0x38d   : > { %2701 = vst.msk [vmem:[%s4885_s17 + $0x88] sm:$0xff] %vm2683_vm3, %v2458_v51  ;;  %v2422_v31 = vmax.f32 %v2293_v3, 0.0 }
 0x38e   : > { %2700 = vst.msk [vmem:[%s4885_s17 + $0x80] sm:$0xff] %vm2683_vm3, %v2456_v7  ;;  %v2384_v44 = vmax.f32 %v2198_v55, 0.0 }
 0x390   : > { %2591 = vmax.xlane.f32.xlu1 %v2379_v32  ;;  %2487 = vmax.xlane.f32.xlu0 %v2327_v43 }
 0x391   : > { %2485 = vmax.xlane.f32.xlu2 %v2326_v33 }
 0x393   : > { %v2460_v56 = vpop.xlane.xlu1 %2459 }
 0x394   : > { %2702 = vst.msk [vmem:[%s4885_s17 + $0x90] sm:$0xff] %vm2683_vm3, %v2460_v56  ;;  %v2638_v40 = vpop.xlane.xlu0 %2637  ;;  %v2636_v50 = vpop.xlane.xlu2 %2635 }
 0x395   : > { %2791 = vst.msk [vmem:[%s4885_s17 + $0x358] sm:$0xff] %vm2683_vm3, %v2638_v40 }
 0x396   : > { %2790 = vst.msk [vmem:[%s4885_s17 + $0x350] sm:$0xff] %vm2683_vm3, %v2636_v50 }
 0x398   : > { %2489 = vmax.xlane.f32.xlu1 %v2328_v35  ;;  %2667 = vmax.xlane.f32.xlu0 %v2417_v46 }
 0x399   : > { %2665 = vmax.xlane.f32.xlu2 %v2416_v37 }
 0x39b   : > { %v2640_v16 = vpop.xlane.xlu1 %2639 }
 0x39c   : > { %2792 = vst.msk [vmem:[%s4885_s17 + $0x360] sm:$0xff] %vm2683_vm3, %v2640_v16  ;;  %v2566_v29 = vpop.xlane.xlu0 %2565  ;;  %v2564_v47 = vpop.xlane.xlu2 %2563 }
 0x39d   : > { %2755 = vst.msk [vmem:[%s4885_s17 + $0x238] sm:$0xff] %vm2683_vm3, %v2566_v29 }
 0x39e   : > { %2754 = vst.msk [vmem:[%s4885_s17 + $0x230] sm:$0xff] %vm2683_vm3, %v2564_v47 }
 0x3a0   : > { %2669 = vmax.xlane.f32.xlu1 %v2418_v12  ;;  %2595 = vmax.xlane.f32.xlu0 %v2381_v10 }
 0x3a1   : > { %2593 = vmax.xlane.f32.xlu2 %v2380_v17 }
 0x3a3   : > { %v2568_v18 = vpop.xlane.xlu1 %2567 }
 0x3a4   : > { %2756 = vst.msk [vmem:[%s4885_s17 + $0x240] sm:$0xff] %vm2683_vm3, %v2568_v18  ;;  %v2464_v53 = vpop.xlane.xlu0 %2463  ;;  %v2462_v59 = vpop.xlane.xlu2 %2461 }
 0x3a5   : > { %2704 = vst.msk [vmem:[%s4885_s17 + $0xa0] sm:$0xff] %vm2683_vm3, %v2464_v53 }
 0x3a6   : > { %2703 = vst.msk [vmem:[%s4885_s17 + $0x98] sm:$0xff] %vm2683_vm3, %v2462_v59 }
 0x3a8   : > { %2597 = vmax.xlane.f32.xlu1 %v2382_v48  ;;  %2601 = vmax.xlane.f32.xlu0 %v2384_v44 }
 0x3a9   : > { %2671 = vmax.xlane.f32.xlu2 %v2419_v28 }
 0x3ab   : > { %v2466_v41 = vpop.xlane.xlu1 %2465 }
 0x3ac   : > { %2705 = vst.msk [vmem:[%s4885_s17 + $0xa8] sm:$0xff] %vm2683_vm3, %v2466_v41  ;;  %v2644_v36 = vpop.xlane.xlu0 %2643  ;;  %v2642_v57 = vpop.xlane.xlu2 %2641 }
 0x3ad   : > { %2794 = vst.msk [vmem:[%s4885_s17 + $0x370] sm:$0xff] %vm2683_vm3, %v2644_v36 }
 0x3ae   : > { %2793 = vst.msk [vmem:[%s4885_s17 + $0x368] sm:$0xff] %vm2683_vm3, %v2642_v57 }
 0x3b0   : > { %2675 = vmax.xlane.f32.xlu1 %v2421_v26  ;;  %2673 = vmax.xlane.f32.xlu0 %v2420_v62 }
 0x3b1   : > { %2599 = vmax.xlane.f32.xlu2 %v2383_v15 }
 0x3b3   : > { %v2646_v6 = vpop.xlane.xlu1 %2645 }
 0x3b4   : > { %2795 = vst.msk [vmem:[%s4885_s17 + $0x378] sm:$0xff] %vm2683_vm3, %v2646_v6  ;;  %v2572_v23 = vpop.xlane.xlu0 %2571  ;;  %v2570_v5 = vpop.xlane.xlu2 %2569 }
 0x3b5   : > { %2758 = vst.msk [vmem:[%s4885_s17 + $0x250] sm:$0xff] %vm2683_vm3, %v2572_v23 }
 0x3b6   : > { %2757 = vst.msk [vmem:[%s4885_s17 + $0x248] sm:$0xff] %vm2683_vm3, %v2570_v5 }
 0x3b9   : > { %2677 = vmax.xlane.f32.xlu2 %v2422_v31 }
 0x3bb   : > { %v2574_v25 = vpop.xlane.xlu1 %2573 }
 0x3bc   : > { %2759 = vst.msk [vmem:[%s4885_s17 + $0x258] sm:$0xff] %vm2683_vm3, %v2574_v25  ;;  %v2470_v30 = vpop.xlane.xlu0 %2469  ;;  %v2468_v54 = vpop.xlane.xlu2 %2467 }
 0x3bd   : > { %2707 = vst.msk [vmem:[%s4885_s17 + $0xb8] sm:$0xff] %vm2683_vm3, %v2470_v30 }
 0x3be   : > { %2706 = vst.msk [vmem:[%s4885_s17 + $0xb0] sm:$0xff] %vm2683_vm3, %v2468_v54 }
 0x3c3   : > { %v2472_v13 = vpop.xlane.xlu1 %2471 }
 0x3c4   : > { %2708 = vst.msk [vmem:[%s4885_s17 + $0xc0] sm:$0xff] %vm2683_vm3, %v2472_v13  ;;  %v2650_v49 = vpop.xlane.xlu0 %2649  ;;  %v2648_v51 = vpop.xlane.xlu2 %2647 }
 0x3c5   : > { %2797 = vst.msk [vmem:[%s4885_s17 + $0x388] sm:$0xff] %vm2683_vm3, %v2650_v49 }
 0x3c6   : > { %2796 = vst.msk [vmem:[%s4885_s17 + $0x380] sm:$0xff] %vm2683_vm3, %v2648_v51 }
 0x3cb   : > { %v2652_v7 = vpop.xlane.xlu1 %2651 }
 0x3cc   : > { %2798 = vst.msk [vmem:[%s4885_s17 + $0x390] sm:$0xff] %vm2683_vm3, %v2652_v7  ;;  %v2578_v43 = vpop.xlane.xlu0 %2577  ;;  %v2576_v32 = vpop.xlane.xlu2 %2575 }
 0x3cd   : > { %2761 = vst.msk [vmem:[%s4885_s17 + $0x268] sm:$0xff] %vm2683_vm3, %v2578_v43 }
 0x3ce   : > { %2760 = vst.msk [vmem:[%s4885_s17 + $0x260] sm:$0xff] %vm2683_vm3, %v2576_v32 }
 0x3d3   : > { %v2580_v33 = vpop.xlane.xlu1 %2579 }
 0x3d4   : > { %2762 = vst.msk [vmem:[%s4885_s17 + $0x270] sm:$0xff] %vm2683_vm3, %v2580_v33  ;;  %v2476_v11 = vpop.xlane.xlu0 %2475  ;;  %v2474_v24 = vpop.xlane.xlu2 %2473 }
 0x3d5   : > { %2710 = vst.msk [vmem:[%s4885_s17 + $0xd0] sm:$0xff] %vm2683_vm3, %v2476_v11 }
 0x3d6   : > { %2709 = vst.msk [vmem:[%s4885_s17 + $0xc8] sm:$0xff] %vm2683_vm3, %v2474_v24 }
 0x3db   : > { %v2478_v8 = vpop.xlane.xlu1 %2477 }
 0x3dc   : > { %2711 = vst.msk [vmem:[%s4885_s17 + $0xd8] sm:$0xff] %vm2683_vm3, %v2478_v8  ;;  %v2656_v21 = vpop.xlane.xlu0 %2655  ;;  %v2654_v52 = vpop.xlane.xlu2 %2653 }
 0x3dd   : > { %2800 = vst.msk [vmem:[%s4885_s17 + $0x3a0] sm:$0xff] %vm2683_vm3, %v2656_v21 }
 0x3de   : > { %2799 = vst.msk [vmem:[%s4885_s17 + $0x398] sm:$0xff] %vm2683_vm3, %v2654_v52 }
 0x3e3   : > { %v2658_v58 = vpop.xlane.xlu1 %2657 }
 0x3e4   : > { %2801 = vst.msk [vmem:[%s4885_s17 + $0x3a8] sm:$0xff] %vm2683_vm3, %v2658_v58  ;;  %v2584_v1 = vpop.xlane.xlu0 %2583  ;;  %v2582_v56 = vpop.xlane.xlu2 %2581 }
 0x3e5   : > { %2764 = vst.msk [vmem:[%s4885_s17 + $0x280] sm:$0xff] %vm2683_vm3, %v2584_v1 }
 0x3e6   : > { %2763 = vst.msk [vmem:[%s4885_s17 + $0x278] sm:$0xff] %vm2683_vm3, %v2582_v56 }
 0x3eb   : > { %v2586_v40 = vpop.xlane.xlu1 %2585 }
 0x3ec   : > { %2765 = vst.msk [vmem:[%s4885_s17 + $0x288] sm:$0xff] %vm2683_vm3, %v2586_v40  ;;  %v2482_v50 = vpop.xlane.xlu0 %2481  ;;  %v2480_v46 = vpop.xlane.xlu2 %2479 }
 0x3ed   : > { %2713 = vst.msk [vmem:[%s4885_s17 + $0xe8] sm:$0xff] %vm2683_vm3, %v2482_v50 }
 0x3ee   : > { %2712 = vst.msk [vmem:[%s4885_s17 + $0xe0] sm:$0xff] %vm2683_vm3, %v2480_v46 }
 0x3f3   : > { %v2484_v35 = vpop.xlane.xlu1 %2483 }
 0x3f4   : > { %2714 = vst.msk [vmem:[%s4885_s17 + $0xf0] sm:$0xff] %vm2683_vm3, %v2484_v35  ;;  %v2662_v37 = vpop.xlane.xlu0 %2661  ;;  %v2660_v38 = vpop.xlane.xlu2 %2659 }
 0x3f5   : > { %2803 = vst.msk [vmem:[%s4885_s17 + $0x3b8] sm:$0xff] %vm2683_vm3, %v2662_v37 }
 0x3f6   : > { %2802 = vst.msk [vmem:[%s4885_s17 + $0x3b0] sm:$0xff] %vm2683_vm3, %v2660_v38 }
 0x3fb   : > { %v2664_v45 = vpop.xlane.xlu1 %2663 }
 0x3fc   : > { %2804 = vst.msk [vmem:[%s4885_s17 + $0x3c0] sm:$0xff] %vm2683_vm3, %v2664_v45  ;;  %v2590_v27 = vpop.xlane.xlu0 %2589  ;;  %v2588_v39 = vpop.xlane.xlu2 %2587 }
 0x3fd   : > { %2767 = vst.msk [vmem:[%s4885_s17 + $0x298] sm:$0xff] %vm2683_vm3, %v2590_v27 }
 0x3fe   : > { %2766 = vst.msk [vmem:[%s4885_s17 + $0x290] sm:$0xff] %vm2683_vm3, %v2588_v39 }
 0x403   : > { %v2592_v63 = vpop.xlane.xlu1 %2591 }
 0x404   : > { %2768 = vst.msk [vmem:[%s4885_s17 + $0x2a0] sm:$0xff] %vm2683_vm3, %v2592_v63  ;;  %v2488_v20 = vpop.xlane.xlu0 %2487  ;;  %v2486_v16 = vpop.xlane.xlu2 %2485 }
 0x405   : > { %2716 = vst.msk [vmem:[%s4885_s17 + $0x100] sm:$0xff] %vm2683_vm3, %v2488_v20 }
 0x406   : > { %2715 = vst.msk [vmem:[%s4885_s17 + $0xf8] sm:$0xff] %vm2683_vm3, %v2486_v16 }
 0x40b   : > { %v2490_v29 = vpop.xlane.xlu1 %2489 }
 0x40c   : > { %2717 = vst.msk [vmem:[%s4885_s17 + $0x108] sm:$0xff] %vm2683_vm3, %v2490_v29  ;;  %v2668_v47 = vpop.xlane.xlu0 %2667  ;;  %v2666_v12 = vpop.xlane.xlu2 %2665 }
 0x40d   : > { %2806 = vst.msk [vmem:[%s4885_s17 + $0x3d0] sm:$0xff] %vm2683_vm3, %v2668_v47 }
 0x40e   : > { %2805 = vst.msk [vmem:[%s4885_s17 + $0x3c8] sm:$0xff] %vm2683_vm3, %v2666_v12 }
 0x413   : > { %v2670_v10 = vpop.xlane.xlu1 %2669 }
 0x414   : > { %2807 = vst.msk [vmem:[%s4885_s17 + $0x3d8] sm:$0xff] %vm2683_vm3, %v2670_v10  ;;  %v2596_v17 = vpop.xlane.xlu0 %2595  ;;  %v2594_v14 = vpop.xlane.xlu2 %2593 }
 0x415   : > { %2770 = vst.msk [vmem:[%s4885_s17 + $0x2b0] sm:$0xff] %vm2683_vm3, %v2596_v17 }
 0x416   : > { %2769 = vst.msk [vmem:[%s4885_s17 + $0x2a8] sm:$0xff] %vm2683_vm3, %v2594_v14 }
 0x41b   : > { %v2598_v19 = vpop.xlane.xlu1 %2597 }
 0x41c   : > { %2771 = vst.msk [vmem:[%s4885_s17 + $0x2b8] sm:$0xff] %vm2683_vm3, %v2598_v19  ;;  %v2602_v4 = vpop.xlane.xlu0 %2601  ;;  %v2672_v0 = vpop.xlane.xlu2 %2671 }
 0x41d   : > { %2773 = vst.msk [vmem:[%s4885_s17 + $0x2c8] sm:$0xff] %vm2683_vm3, %v2602_v4 }
 0x41e   : > { %2808 = vst.msk [vmem:[%s4885_s17 + $0x3e0] sm:$0xff] %vm2683_vm3, %v2672_v0 }
 0x423   : > { %v2676_v55 = vpop.xlane.xlu1 %2675 }
 0x424   : > { %2810 = vst.msk [vmem:[%s4885_s17 + $0x3f0] sm:$0xff] %vm2683_vm3, %v2676_v55  ;;  %v2674_v61 = vpop.xlane.xlu0 %2673  ;;  %v2600_v18 = vpop.xlane.xlu2 %2599 }
 0x425   : > { %2809 = vst.msk [vmem:[%s4885_s17 + $0x3e8] sm:$0xff] %vm2683_vm3, %v2674_v61 }
 0x426   : > { %2772 = vst.msk [vmem:[%s4885_s17 + $0x2c0] sm:$0xff] %vm2683_vm3, %v2600_v18 }
 0x42c   : > { %v2678_v53 = vpop.xlane.xlu2 %2677 }
 0x42d   : > { %2811 = vst.msk [vmem:[%s4885_s17 + $0x3f8] sm:$0xff] %vm2683_vm3, %v2678_v53 }
 0x42e PF: > { %s17_s26 = sadd.s32 1, %s3745_s26   ;;  %s5502_s24 = smov %s3741_s25 }
 0x42f   : > { %p14_p5 = scmp.ge.s32.totalorder %s17_s26, 4   ;;  %s5503_s25 = smov %s5505_s27 }
 0x431   :  { %16 = sbr.rel (!%p14_p5) target bundleno = 2 (0x2), region = 86 }

</bundles_post_ra>
